<compile_context>
chip_gen: v7x
topology: tpu7x:2x2x1
jax: 0.10.0
libtpu: 0.0.40
codegen_flags: <defaults>
</compile_context>

<pallas_src>
import functools

import jax
import jax.numpy as jnp
import numpy as np
from jax.experimental import pallas as pl
from jax.experimental.pallas import tpu as pltpu


# ----------------------------------------------------------------------------
# In-kernel GAT layer (helper traced inside the fused kernel)
# ----------------------------------------------------------------------------
def _gat_layer(x, w_ref, a_ref, b_ref, edge, *, heads, f_out, apply_relu):
    """One GATConv layer (PyG semantics, concat=True, negative_slope=0.2)."""
    # Linear transform on the MXU.
    h = jnp.dot(x, w_ref[...], preferred_element_type=jnp.float32)  # [N, H*F]
    # All-head attention scores in one MXU matmul against the block-diagonal
    # attention matrix: cols [0:H) = a_src per head, cols [H:2H) = a_dst.
    scores = jnp.dot(h, a_ref[...], preferred_element_type=jnp.float32)  # [N, 2H]

    outs = []
    for hh in range(heads):                      # heads <= 2, static -> unrolled
        a_src = scores[:, hh:hh + 1]             # [N, 1]
        a_dst = scores[:, heads + hh:heads + hh + 1]

        # e[i, j] = LeakyReLU(a_src[j] + a_dst[i])
        e = a_dst + a_src.T                      # [N, N]
        e = jnp.where(e >= 0, e, 0.2 * e)

        # Softmax over sources j; non-edges zeroed by `* edge` after exp
        # (subtracting the unmasked row max is numerically safe: exp <= 1 and
        # the common scale cancels between numerator and denominator).
        e = e - jnp.max(e, axis=1, keepdims=True)
        p = jnp.exp(e) * edge
        denom = jnp.maximum(jnp.sum(p, axis=1, keepdims=True), 1e-20)
        alpha = p * pl.reciprocal(denom, approx=True)            # EUP vrcp

        # Weighted aggregation of neighbour features (MXU).
        outs.append(jnp.dot(alpha, h[:, hh * f_out:(hh + 1) * f_out],
                            preferred_element_type=jnp.float32))

    out = outs[0] if heads == 1 else jnp.concatenate(outs, axis=1)
    out = out + b_ref[...]                       # bias once, full width
    if apply_relu:
        out = jnp.maximum(out, 0.0)
    return out


# ----------------------------------------------------------------------------
# Fused Model forward kernel: encoder -> masked max pool -> decoder
# ----------------------------------------------------------------------------
def _fused_model_kernel(src_x_ref, src_adj_ref, pool_sel_ref, gather_ref,
                        tgt_x_ref, tgt_adj_ref, *rest,
                        enc_cfg, dec_cfg, tgt_all_lyr, num_graphs):
    n_layers = len(enc_cfg) + len(dec_cfg)
    param_refs = rest[:3 * n_layers]             # (W, A, bias) per layer
    z_ref = rest[3 * n_layers]
    out_ref = rest[3 * n_layers + 1]

    src_edge = (src_adj_ref[...] > 0).astype(jnp.float32)
    tgt_edge = (tgt_adj_ref[...] > 0).astype(jnp.float32)

    # --- GATEnc ---
    x = src_x_ref[...]
    for i, (heads, f_out, relu) in enumerate(enc_cfg):
        w_ref, a_ref, b_ref = param_refs[3 * i:3 * i + 3]
        x = _gat_layer(x, w_ref, a_ref, b_ref, src_edge,
                       heads=heads, f_out=f_out, apply_relu=relu)

    # --- masked global max pool (single lane-dense store) ---
    sel = pool_sel_ref[...]                                  # [B, N]
    rows = []
    for b in range(num_graphs):                              # B tiny & static
        m = sel[b:b + 1, :].T                                # [N, 1]
        masked = jnp.where(m > 0, x, jnp.float32(-1e30))
        rows.append(jnp.max(masked, axis=0, keepdims=True))  # [1, Z]
    z = rows[0] if num_graphs == 1 else jnp.concatenate(rows, axis=0)
    z_ref[...] = z

    # --- GATDec ---
    # Batch gather z[tgt_batch] as a one-hot matmul on the MXU.
    dec_x = jnp.dot(gather_ref[...], z, preferred_element_type=jnp.float32)
    tgt_x = tgt_x_ref[...]
    off = 3 * len(enc_cfg)
    for i, (heads, f_out, relu) in enumerate(dec_cfg):
        if tgt_all_lyr or i == 0:
            dec_x = jnp.concatenate([dec_x, tgt_x], axis=1)
        w_ref, a_ref, b_ref = param_refs[off + 3 * i:off + 3 * i + 3]
        dec_x = _gat_layer(dec_x, w_ref, a_ref, b_ref, tgt_edge,
                           heads=heads, f_out=f_out, apply_relu=relu)
    out_ref[...] = dec_x


# ----------------------------------------------------------------------------
# Wrapper around pallas_call
# ----------------------------------------------------------------------------
def model_forward(params, src_x, src_adj, pool_sel, tgt_x, tgt_adj, gather_mat,
                  *, tgt_all_lyr):
    enc, dec = params["enc"], params["dec"]
    enc_cfg = tuple((p["heads"], p["f_out"], i + 1 != len(enc))
                    for i, p in enumerate(enc))
    dec_cfg = tuple((p["heads"], p["f_out"], i + 1 != len(dec))
                    for i, p in enumerate(dec))
    flat_params = []
    for p in enc + dec:
        flat_params += [p["W"], p["A"], p["bias"]]

    n = src_x.shape[0]
    num_graphs = pool_sel.shape[0]
    z_dim = enc[-1]["heads"] * enc[-1]["f_out"]
    out_dim = dec[-1]["heads"] * dec[-1]["f_out"]

    kernel = functools.partial(_fused_model_kernel,
                               enc_cfg=enc_cfg, dec_cfg=dec_cfg,
                               tgt_all_lyr=tgt_all_lyr, num_graphs=num_graphs)
    vmem = pl.BlockSpec(memory_space=pltpu.MemorySpace.VMEM)
    z, hatD = pl.pallas_call(
        kernel,
        out_shape=(jax.ShapeDtypeStruct((num_graphs, z_dim), jnp.float32),
                   jax.ShapeDtypeStruct((n, out_dim), jnp.float32)),
        in_specs=[vmem] * (6 + len(flat_params)),
        out_specs=(vmem, vmem),
    )(src_x, src_adj, pool_sel, gather_mat, tgt_x, tgt_adj, *flat_params)
    return z, hatD


# ----------------------------------------------------------------------------
# Parameter construction (deterministic, mirrors GATEnc / GATDec __init__)
# ----------------------------------------------------------------------------
def _glorot(key, shape):
    fan_in = shape[-2] if len(shape) > 1 else 1
    fan_out = shape[-1]
    lim = np.sqrt(6.0 / (fan_in + fan_out))
    return jax.random.uniform(key, shape, jnp.float32, -lim, lim)


def init_gat_params(key, f_in, f_out, heads):
    k1, k2, k3 = jax.random.split(key, 3)
    a_src = np.asarray(_glorot(k2, (heads, f_out)))
    a_dst = np.asarray(_glorot(k3, (heads, f_out)))
    # Block-diagonal attention matrix: one MXU matmul computes all per-head
    # src/dst scores at once.  cols [0:heads) = a_src, cols [heads:2*heads) = a_dst.
    A = np.zeros((heads * f_out, 2 * heads), np.float32)
    for hh in range(heads):
        A[hh * f_out:(hh + 1) * f_out, hh] = a_src[hh]
        A[hh * f_out:(hh + 1) * f_out, heads + hh] = a_dst[hh]
    return {
        "W": _glorot(k1, (f_in, heads * f_out)),
        "A": jnp.asarray(A),
        "bias": jnp.zeros((1, heads * f_out), jnp.float32),
        "heads": heads,
        "f_out": f_out,
    }


def build_enc_layer_dims(skel_dim, pose_dim, z_dim, enc_cfg):
    e_fs = [skel_dim + pose_dim] + enc_cfg["hid_lyrs"] + [z_dim]
    dims = []
    for i, (fp, fi) in enumerate(zip(e_fs[:-1], e_fs[1:])):
        if i != 0:
            fp *= enc_cfg["heads_num"]
        heads = enc_cfg["heads_num"] if i != len(e_fs) - 2 else 1
        dims.append((fp, fi, heads))
    return dims


def build_dec_layer_dims(skel_dim, out_dim, z_dim, dec_cfg):
    d_fs = [skel_dim + z_dim] + dec_cfg["hid_lyrs"] + [out_dim]
    dims = []
    for i, (fp, fi) in enumerate(zip(d_fs[:-1], d_fs[1:])):
        if i != 0:
            fp *= dec_cfg["heads_num"]
        heads = dec_cfg["heads_num"] if i != len(d_fs) - 2 else 1
        if dec_cfg["tgt_all_lyr"] and i != 0:
            fp += skel_dim
        dims.append((fp, fi, heads))
    return dims


# ----------------------------------------------------------------------------
# Main
# ----------------------------------------------------------------------------
if __name__ == "__main__":
    # Representation / model config (stands in for rep_dim + yaml cfg).
    REP_DIM = {"offset": 3, "rot6d": 6}
    rep_cfg = {"skel": ["offset"], "pose": ["rot6d"], "out": ["rot6d"]}
    model_cfg = {
        "z_dim": 16,
        "Encoder": {"hid_lyrs": [32], "heads_num": 2},
        "Decoder": {"hid_lyrs": [32], "heads_num": 2, "tgt_all_lyr": True},
    }
    skel_dim = sum(REP_DIM[k] for k in rep_cfg["skel"])     # 3
    pose_dim = sum(REP_DIM[k] for k in rep_cfg["pose"])     # 6
    out_dim = sum(REP_DIM[k] for k in rep_cfg["out"])       # 6
    z_dim = model_cfg["z_dim"]

    # Parameters.
    key = jax.random.PRNGKey(0)
    enc_dims = build_enc_layer_dims(skel_dim, pose_dim, z_dim, model_cfg["Encoder"])
    dec_dims = build_dec_layer_dims(skel_dim, out_dim, z_dim, model_cfg["Decoder"])
    keys = jax.random.split(key, len(enc_dims) + len(dec_dims) + 4)
    params = {
        "enc": [init_gat_params(keys[i], *d) for i, d in enumerate(enc_dims)],
        "dec": [init_gat_params(keys[len(enc_dims) + i], *d)
                for i, d in enumerate(dec_dims)],
    }

    # Synthetic batched graph: 2 graphs, 8 nodes each, chain topology.
    num_graphs, nodes_per_graph = 2, 8
    n_total = num_graphs * nodes_per_graph
    batch_np = np.repeat(np.arange(num_graphs), nodes_per_graph)

    adj_np = np.eye(n_total, dtype=np.float32)              # self loops (add_self_loops=True)
    for g in range(num_graphs):
        base = g * nodes_per_graph
        for i in range(nodes_per_graph - 1):                 # bidirectional chain edges
            adj_np[base + i, base + i + 1] = 1.0
            adj_np[base + i + 1, base + i] = 1.0
    # TODO(synk): edge_mask_bidirection is ignored — PyG GATConv with edge_dim=None
    # does not use edge_attr in attention, so it has no effect on the math.

    # Encoder V_mask handling (V_mask.sum() > 0 branch resolved in Python glue):
    v_mask_np = np.zeros(n_total, dtype=bool)
    v_mask_np[nodes_per_graph - 1] = True                    # mask one node of graph 0
    valid = (~v_mask_np) if v_mask_np.sum() > 0 else np.ones(n_total, dtype=bool)
    pool_sel_np = np.zeros((num_graphs, n_total), dtype=np.float32)
    for i in range(n_total):
        if valid[i]:
            pool_sel_np[batch_np[i], i] = 1.0

    # One-hot gather matrix for z[tgt_batch] (fused into the kernel as a matmul).
    gather_np = np.zeros((n_total, num_graphs), dtype=np.float32)
    gather_np[np.arange(n_total), batch_np] = 1.0

    # Node features.
    kx, kt = jax.random.split(keys[-1], 2)
    src_x = jax.random.normal(kx, (n_total, skel_dim + pose_dim), jnp.float32)
    tgt_x = jax.random.normal(kt, (n_total, skel_dim), jnp.float32)

    src_adj = jnp.asarray(adj_np)
    tgt_adj = jnp.asarray(adj_np)
    pool_sel = jnp.asarray(pool_sel_np)
    gather_mat = jnp.asarray(gather_np)

    z, hatD = model_forward(params, src_x, src_adj, pool_sel,
                            tgt_x, tgt_adj, gather_mat,
                            tgt_all_lyr=model_cfg["Decoder"]["tgt_all_lyr"])
    jax.block_until_ready((z, hatD))

    assert z.shape == (num_graphs, z_dim), z.shape
    assert hatD.shape == (n_total, out_dim), hatD.shape
    assert bool(jnp.all(jnp.isfinite(z))) and bool(jnp.all(jnp.isfinite(hatD)))
    print("KERNEL_OK")
</pallas_src>

<mosaic_0001>
module attributes {stable_mosaic.version = 11 : i64} {
  func.func @_fused_model_kernel(%arg0: memref<16x9xf32, #tpu.memory_space<vmem>>, %arg1: memref<16x16xf32, #tpu.memory_space<vmem>>, %arg2: memref<2x16xf32, #tpu.memory_space<vmem>>, %arg3: memref<16x2xf32, #tpu.memory_space<vmem>>, %arg4: memref<16x3xf32, #tpu.memory_space<vmem>>, %arg5: memref<16x16xf32, #tpu.memory_space<vmem>>, %arg6: memref<9x64xf32, #tpu.memory_space<vmem>>, %arg7: memref<64x4xf32, #tpu.memory_space<vmem>>, %arg8: memref<1x64xf32, #tpu.memory_space<vmem>>, %arg9: memref<64x16xf32, #tpu.memory_space<vmem>>, %arg10: memref<16x2xf32, #tpu.memory_space<vmem>>, %arg11: memref<1x16xf32, #tpu.memory_space<vmem>>, %arg12: memref<19x64xf32, #tpu.memory_space<vmem>>, %arg13: memref<64x4xf32, #tpu.memory_space<vmem>>, %arg14: memref<1x64xf32, #tpu.memory_space<vmem>>, %arg15: memref<67x6xf32, #tpu.memory_space<vmem>>, %arg16: memref<6x2xf32, #tpu.memory_space<vmem>>, %arg17: memref<1x6xf32, #tpu.memory_space<vmem>>, %arg18: memref<2x16xf32, #tpu.memory_space<vmem>>, %arg19: memref<16x6xf32, #tpu.memory_space<vmem>>) attributes {dimension_semantics = [], scalar_prefetch = 0 : i64, scratch_operands = 0 : i64, tpu.core_type = #tpu.core_type<tc>} {
    %c0 = arith.constant 0 : index
    %c0_0 = arith.constant 0 : index
    %0 = vector.load %arg1[%c0, %c0_0] : memref<16x16xf32, #tpu.memory_space<vmem>>, vector<16x16xf32>
    %cst = arith.constant 0.000000e+00 : f32
    %1 = vector.broadcast %cst : f32 to vector<16x16xf32>
    %2 = arith.cmpf ogt, %0, %1 : vector<16x16xf32>
    %3 = arith.extui %2 : vector<16x16xi1> to vector<16x16xi32>
    %4 = arith.sitofp %3 : vector<16x16xi32> to vector<16x16xf32>
    %c0_1 = arith.constant 0 : index
    %c0_2 = arith.constant 0 : index
    %5 = vector.load %arg5[%c0_1, %c0_2] : memref<16x16xf32, #tpu.memory_space<vmem>>, vector<16x16xf32>
    %cst_3 = arith.constant 0.000000e+00 : f32
    %6 = vector.broadcast %cst_3 : f32 to vector<16x16xf32>
    %7 = arith.cmpf ogt, %5, %6 : vector<16x16xf32>
    %8 = arith.extui %7 : vector<16x16xi1> to vector<16x16xi32>
    %9 = arith.sitofp %8 : vector<16x16xi32> to vector<16x16xf32>
    %c0_4 = arith.constant 0 : index
    %c0_5 = arith.constant 0 : index
    %10 = vector.load %arg0[%c0_4, %c0_5] : memref<16x9xf32, #tpu.memory_space<vmem>>, vector<16x9xf32>
    %c0_6 = arith.constant 0 : index
    %c0_7 = arith.constant 0 : index
    %11 = vector.load %arg6[%c0_6, %c0_7] : memref<9x64xf32, #tpu.memory_space<vmem>>, vector<9x64xf32>
    %cst_8 = arith.constant dense<0.000000e+00> : vector<16x64xf32>
    %12 = tpu.matmul %10, %11, %cst_8 {dimension_numbers = #tpu.dot_dimension_numbers<[1], [0], [0], [1], [0, 0, 1, 1], [], []>} : vector<16x9xf32>, vector<9x64xf32>, vector<16x64xf32> -> vector<16x64xf32>
    %c0_9 = arith.constant 0 : index
    %c0_10 = arith.constant 0 : index
    %13 = vector.load %arg7[%c0_9, %c0_10] : memref<64x4xf32, #tpu.memory_space<vmem>>, vector<64x4xf32>
    %cst_11 = arith.constant dense<0.000000e+00> : vector<16x4xf32>
    %14 = tpu.matmul %12, %13, %cst_11 {dimension_numbers = #tpu.dot_dimension_numbers<[1], [0], [0], [1], [0, 0, 1, 1], [], []>} : vector<16x64xf32>, vector<64x4xf32>, vector<16x4xf32> -> vector<16x4xf32>
    %15 = vector.extract_strided_slice %14 {offsets = [0, 0], sizes = [16, 1], strides = [1, 1]} : vector<16x4xf32> to vector<16x1xf32>
    %16 = vector.extract_strided_slice %14 {offsets = [0, 2], sizes = [16, 1], strides = [1, 1]} : vector<16x4xf32> to vector<16x1xf32>
    %17 = tpu.transpose %15, [1, 0] : vector<16x1xf32> -> vector<1x16xf32>
    %18 = vector.broadcast %16 : vector<16x1xf32> to vector<16x16xf32>
    %19 = vector.broadcast %17 : vector<1x16xf32> to vector<16x16xf32>
    %20 = arith.addf %18, %19 : vector<16x16xf32>
    %cst_12 = arith.constant 0.000000e+00 : f32
    %21 = vector.broadcast %cst_12 : f32 to vector<16x16xf32>
    %22 = arith.cmpf oge, %20, %21 : vector<16x16xf32>
    %cst_13 = arith.constant 2.000000e-01 : f32
    %23 = vector.broadcast %cst_13 : f32 to vector<16x16xf32>
    %24 = arith.mulf %23, %20 : vector<16x16xf32>
    %25 = arith.select %22, %20, %24 : vector<16x16xi1>, vector<16x16xf32>
    %cst_14 = arith.constant dense<0xFF800000> : vector<16xf32>
    %26 = vector.multi_reduction <maximumf>, %25, %cst_14 [1] : vector<16x16xf32> to vector<16xf32>
    %27 = vector.shape_cast %26 : vector<16xf32> to vector<16x1xf32>
    %28 = vector.broadcast %27 : vector<16x1xf32> to vector<16x16xf32>
    %29 = arith.subf %25, %28 : vector<16x16xf32>
    %30 = math.exp %29 : vector<16x16xf32>
    %31 = arith.mulf %30, %4 : vector<16x16xf32>
    %cst_15 = arith.constant dense<0.000000e+00> : vector<16xf32>
    %32 = vector.multi_reduction <add>, %31, %cst_15 [1] : vector<16x16xf32> to vector<16xf32>
    %33 = vector.shape_cast %32 : vector<16xf32> to vector<16x1xf32>
    %cst_16 = arith.constant 9.99999968E-21 : f32
    %34 = vector.broadcast %cst_16 : f32 to vector<16x1xf32>
    %35 = arith.maximumf %33, %34 : vector<16x1xf32>
    %36 = tpu.reciprocal %35 {approx = true} : vector<16x1xf32> -> vector<16x1xf32>
    %37 = vector.broadcast %36 : vector<16x1xf32> to vector<16x16xf32>
    %38 = arith.mulf %31, %37 : vector<16x16xf32>
    %39 = vector.extract_strided_slice %12 {offsets = [0, 0], sizes = [16, 32], strides = [1, 1]} : vector<16x64xf32> to vector<16x32xf32>
    %cst_17 = arith.constant dense<0.000000e+00> : vector<16x32xf32>
    %40 = tpu.matmul %38, %39, %cst_17 {dimension_numbers = #tpu.dot_dimension_numbers<[1], [0], [0], [1], [0, 0, 1, 1], [], []>} : vector<16x16xf32>, vector<16x32xf32>, vector<16x32xf32> -> vector<16x32xf32>
    %41 = vector.extract_strided_slice %14 {offsets = [0, 1], sizes = [16, 1], strides = [1, 1]} : vector<16x4xf32> to vector<16x1xf32>
    %42 = vector.extract_strided_slice %14 {offsets = [0, 3], sizes = [16, 1], strides = [1, 1]} : vector<16x4xf32> to vector<16x1xf32>
    %43 = tpu.transpose %41, [1, 0] : vector<16x1xf32> -> vector<1x16xf32>
    %44 = vector.broadcast %42 : vector<16x1xf32> to vector<16x16xf32>
    %45 = vector.broadcast %43 : vector<1x16xf32> to vector<16x16xf32>
    %46 = arith.addf %44, %45 : vector<16x16xf32>
    %cst_18 = arith.constant 0.000000e+00 : f32
    %47 = vector.broadcast %cst_18 : f32 to vector<16x16xf32>
    %48 = arith.cmpf oge, %46, %47 : vector<16x16xf32>
    %cst_19 = arith.constant 2.000000e-01 : f32
    %49 = vector.broadcast %cst_19 : f32 to vector<16x16xf32>
    %50 = arith.mulf %49, %46 : vector<16x16xf32>
    %51 = arith.select %48, %46, %50 : vector<16x16xi1>, vector<16x16xf32>
    %cst_20 = arith.constant dense<0xFF800000> : vector<16xf32>
    %52 = vector.multi_reduction <maximumf>, %51, %cst_20 [1] : vector<16x16xf32> to vector<16xf32>
    %53 = vector.shape_cast %52 : vector<16xf32> to vector<16x1xf32>
    %54 = vector.broadcast %53 : vector<16x1xf32> to vector<16x16xf32>
    %55 = arith.subf %51, %54 : vector<16x16xf32>
    %56 = math.exp %55 : vector<16x16xf32>
    %57 = arith.mulf %56, %4 : vector<16x16xf32>
    %cst_21 = arith.constant dense<0.000000e+00> : vector<16xf32>
    %58 = vector.multi_reduction <add>, %57, %cst_21 [1] : vector<16x16xf32> to vector<16xf32>
    %59 = vector.shape_cast %58 : vector<16xf32> to vector<16x1xf32>
    %cst_22 = arith.constant 9.99999968E-21 : f32
    %60 = vector.broadcast %cst_22 : f32 to vector<16x1xf32>
    %61 = arith.maximumf %59, %60 : vector<16x1xf32>
    %62 = tpu.reciprocal %61 {approx = true} : vector<16x1xf32> -> vector<16x1xf32>
    %63 = vector.broadcast %62 : vector<16x1xf32> to vector<16x16xf32>
    %64 = arith.mulf %57, %63 : vector<16x16xf32>
    %65 = vector.extract_strided_slice %12 {offsets = [0, 32], sizes = [16, 32], strides = [1, 1]} : vector<16x64xf32> to vector<16x32xf32>
    %cst_23 = arith.constant dense<0.000000e+00> : vector<16x32xf32>
    %66 = tpu.matmul %64, %65, %cst_23 {dimension_numbers = #tpu.dot_dimension_numbers<[1], [0], [0], [1], [0, 0, 1, 1], [], []>} : vector<16x16xf32>, vector<16x32xf32>, vector<16x32xf32> -> vector<16x32xf32>
    %67 = tpu.concatenate %40, %66 in 1 : vector<16x32xf32>, vector<16x32xf32> -> vector<16x64xf32>
    %c0_24 = arith.constant 0 : index
    %c0_25 = arith.constant 0 : index
    %68 = vector.load %arg8[%c0_24, %c0_25] : memref<1x64xf32, #tpu.memory_space<vmem>>, vector<1x64xf32>
    %69 = vector.broadcast %68 : vector<1x64xf32> to vector<16x64xf32>
    %70 = arith.addf %67, %69 : vector<16x64xf32>
    %cst_26 = arith.constant 0.000000e+00 : f32
    %71 = vector.broadcast %cst_26 : f32 to vector<16x64xf32>
    %72 = arith.maximumf %70, %71 : vector<16x64xf32>
    %c0_27 = arith.constant 0 : index
    %c0_28 = arith.constant 0 : index
    %73 = vector.load %arg9[%c0_27, %c0_28] : memref<64x16xf32, #tpu.memory_space<vmem>>, vector<64x16xf32>
    %cst_29 = arith.constant dense<0.000000e+00> : vector<16x16xf32>
    %74 = tpu.matmul %72, %73, %cst_29 {dimension_numbers = #tpu.dot_dimension_numbers<[1], [0], [0], [1], [0, 0, 1, 1], [], []>} : vector<16x64xf32>, vector<64x16xf32>, vector<16x16xf32> -> vector<16x16xf32>
    %c0_30 = arith.constant 0 : index
    %c0_31 = arith.constant 0 : index
    %75 = vector.load %arg10[%c0_30, %c0_31] : memref<16x2xf32, #tpu.memory_space<vmem>>, vector<16x2xf32>
    %cst_32 = arith.constant dense<0.000000e+00> : vector<16x2xf32>
    %76 = tpu.matmul %74, %75, %cst_32 {dimension_numbers = #tpu.dot_dimension_numbers<[1], [0], [0], [1], [0, 0, 1, 1], [], []>} : vector<16x16xf32>, vector<16x2xf32>, vector<16x2xf32> -> vector<16x2xf32>
    %77 = vector.extract_strided_slice %76 {offsets = [0, 0], sizes = [16, 1], strides = [1, 1]} : vector<16x2xf32> to vector<16x1xf32>
    %78 = vector.extract_strided_slice %76 {offsets = [0, 1], sizes = [16, 1], strides = [1, 1]} : vector<16x2xf32> to vector<16x1xf32>
    %79 = tpu.transpose %77, [1, 0] : vector<16x1xf32> -> vector<1x16xf32>
    %80 = vector.broadcast %78 : vector<16x1xf32> to vector<16x16xf32>
    %81 = vector.broadcast %79 : vector<1x16xf32> to vector<16x16xf32>
    %82 = arith.addf %80, %81 : vector<16x16xf32>
    %cst_33 = arith.constant 0.000000e+00 : f32
    %83 = vector.broadcast %cst_33 : f32 to vector<16x16xf32>
    %84 = arith.cmpf oge, %82, %83 : vector<16x16xf32>
    %cst_34 = arith.constant 2.000000e-01 : f32
    %85 = vector.broadcast %cst_34 : f32 to vector<16x16xf32>
    %86 = arith.mulf %85, %82 : vector<16x16xf32>
    %87 = arith.select %84, %82, %86 : vector<16x16xi1>, vector<16x16xf32>
    %cst_35 = arith.constant dense<0xFF800000> : vector<16xf32>
    %88 = vector.multi_reduction <maximumf>, %87, %cst_35 [1] : vector<16x16xf32> to vector<16xf32>
    %89 = vector.shape_cast %88 : vector<16xf32> to vector<16x1xf32>
    %90 = vector.broadcast %89 : vector<16x1xf32> to vector<16x16xf32>
    %91 = arith.subf %87, %90 : vector<16x16xf32>
    %92 = math.exp %91 : vector<16x16xf32>
    %93 = arith.mulf %92, %4 : vector<16x16xf32>
    %cst_36 = arith.constant dense<0.000000e+00> : vector<16xf32>
    %94 = vector.multi_reduction <add>, %93, %cst_36 [1] : vector<16x16xf32> to vector<16xf32>
    %95 = vector.shape_cast %94 : vector<16xf32> to vector<16x1xf32>
    %cst_37 = arith.constant 9.99999968E-21 : f32
    %96 = vector.broadcast %cst_37 : f32 to vector<16x1xf32>
    %97 = arith.maximumf %95, %96 : vector<16x1xf32>
    %98 = tpu.reciprocal %97 {approx = true} : vector<16x1xf32> -> vector<16x1xf32>
    %99 = vector.broadcast %98 : vector<16x1xf32> to vector<16x16xf32>
    %100 = arith.mulf %93, %99 : vector<16x16xf32>
    %cst_38 = arith.constant dense<0.000000e+00> : vector<16x16xf32>
    %101 = tpu.matmul %100, %74, %cst_38 {dimension_numbers = #tpu.dot_dimension_numbers<[1], [0], [0], [1], [0, 0, 1, 1], [], []>} : vector<16x16xf32>, vector<16x16xf32>, vector<16x16xf32> -> vector<16x16xf32>
    %c0_39 = arith.constant 0 : index
    %c0_40 = arith.constant 0 : index
    %102 = vector.load %arg11[%c0_39, %c0_40] : memref<1x16xf32, #tpu.memory_space<vmem>>, vector<1x16xf32>
    %103 = vector.broadcast %102 : vector<1x16xf32> to vector<16x16xf32>
    %104 = arith.addf %101, %103 : vector<16x16xf32>
    %c0_41 = arith.constant 0 : index
    %c0_42 = arith.constant 0 : index
    %105 = vector.load %arg2[%c0_41, %c0_42] : memref<2x16xf32, #tpu.memory_space<vmem>>, vector<2x16xf32>
    %106 = vector.extract_strided_slice %105 {offsets = [0, 0], sizes = [1, 16], strides = [1, 1]} : vector<2x16xf32> to vector<1x16xf32>
    %107 = tpu.transpose %106, [1, 0] : vector<1x16xf32> -> vector<16x1xf32>
    %cst_43 = arith.constant 0.000000e+00 : f32
    %108 = vector.broadcast %cst_43 : f32 to vector<16x1xf32>
    %109 = arith.cmpf ogt, %107, %108 : vector<16x1xf32>
    %cst_44 = arith.constant -1.000000e+30 : f32
    %110 = vector.shape_cast %109 : vector<16x1xi1> to vector<16x1xi1>
    %111 = vector.broadcast %110 : vector<16x1xi1> to vector<16x16xi1>
    %112 = vector.broadcast %cst_44 : f32 to vector<16x16xf32>
    %113 = arith.select %111, %104, %112 : vector<16x16xi1>, vector<16x16xf32>
    %cst_45 = arith.constant dense<0xFF800000> : vector<16xf32>
    %114 = vector.multi_reduction <maximumf>, %113, %cst_45 [0] : vector<16x16xf32> to vector<16xf32>
    %115 = vector.shape_cast %114 : vector<16xf32> to vector<1x16xf32>
    %116 = vector.extract_strided_slice %105 {offsets = [1, 0], sizes = [1, 16], strides = [1, 1]} : vector<2x16xf32> to vector<1x16xf32>
    %117 = tpu.transpose %116, [1, 0] : vector<1x16xf32> -> vector<16x1xf32>
    %cst_46 = arith.constant 0.000000e+00 : f32
    %118 = vector.broadcast %cst_46 : f32 to vector<16x1xf32>
    %119 = arith.cmpf ogt, %117, %118 : vector<16x1xf32>
    %cst_47 = arith.constant -1.000000e+30 : f32
    %120 = vector.shape_cast %119 : vector<16x1xi1> to vector<16x1xi1>
    %121 = vector.broadcast %120 : vector<16x1xi1> to vector<16x16xi1>
    %122 = vector.broadcast %cst_47 : f32 to vector<16x16xf32>
    %123 = arith.select %121, %104, %122 : vector<16x16xi1>, vector<16x16xf32>
    %cst_48 = arith.constant dense<0xFF800000> : vector<16xf32>
    %124 = vector.multi_reduction <maximumf>, %123, %cst_48 [0] : vector<16x16xf32> to vector<16xf32>
    %125 = vector.shape_cast %124 : vector<16xf32> to vector<1x16xf32>
    %126 = tpu.concatenate %115, %125 in 0 : vector<1x16xf32>, vector<1x16xf32> -> vector<2x16xf32>
    %c0_49 = arith.constant 0 : index
    %c0_50 = arith.constant 0 : index
    %127 = vector.load %arg18[%c0_49, %c0_50] : memref<2x16xf32, #tpu.memory_space<vmem>>, vector<2x16xf32>
    tpu.vector_store %arg18[%c0_49, %c0_50], %126 {strides = array<i32>} : memref<2x16xf32, #tpu.memory_space<vmem>>, vector<2x16xf32>,
    %c0_51 = arith.constant 0 : index
    %c0_52 = arith.constant 0 : index
    %128 = vector.load %arg3[%c0_51, %c0_52] : memref<16x2xf32, #tpu.memory_space<vmem>>, vector<16x2xf32>
    %cst_53 = arith.constant dense<0.000000e+00> : vector<16x16xf32>
    %129 = tpu.matmul %128, %126, %cst_53 {dimension_numbers = #tpu.dot_dimension_numbers<[1], [0], [0], [1], [0, 0, 1, 1], [], []>} : vector<16x2xf32>, vector<2x16xf32>, vector<16x16xf32> -> vector<16x16xf32>
    %c0_54 = arith.constant 0 : index
    %c0_55 = arith.constant 0 : index
    %130 = vector.load %arg4[%c0_54, %c0_55] : memref<16x3xf32, #tpu.memory_space<vmem>>, vector<16x3xf32>
    %131 = tpu.concatenate %129, %130 in 1 : vector<16x16xf32>, vector<16x3xf32> -> vector<16x19xf32>
    %c0_56 = arith.constant 0 : index
    %c0_57 = arith.constant 0 : index
    %132 = vector.load %arg12[%c0_56, %c0_57] : memref<19x64xf32, #tpu.memory_space<vmem>>, vector<19x64xf32>
    %cst_58 = arith.constant dense<0.000000e+00> : vector<16x64xf32>
    %133 = tpu.matmul %131, %132, %cst_58 {dimension_numbers = #tpu.dot_dimension_numbers<[1], [0], [0], [1], [0, 0, 1, 1], [], []>} : vector<16x19xf32>, vector<19x64xf32>, vector<16x64xf32> -> vector<16x64xf32>
    %c0_59 = arith.constant 0 : index
    %c0_60 = arith.constant 0 : index
    %134 = vector.load %arg13[%c0_59, %c0_60] : memref<64x4xf32, #tpu.memory_space<vmem>>, vector<64x4xf32>
    %cst_61 = arith.constant dense<0.000000e+00> : vector<16x4xf32>
    %135 = tpu.matmul %133, %134, %cst_61 {dimension_numbers = #tpu.dot_dimension_numbers<[1], [0], [0], [1], [0, 0, 1, 1], [], []>} : vector<16x64xf32>, vector<64x4xf32>, vector<16x4xf32> -> vector<16x4xf32>
    %136 = vector.extract_strided_slice %135 {offsets = [0, 0], sizes = [16, 1], strides = [1, 1]} : vector<16x4xf32> to vector<16x1xf32>
    %137 = vector.extract_strided_slice %135 {offsets = [0, 2], sizes = [16, 1], strides = [1, 1]} : vector<16x4xf32> to vector<16x1xf32>
    %138 = tpu.transpose %136, [1, 0] : vector<16x1xf32> -> vector<1x16xf32>
    %139 = vector.broadcast %137 : vector<16x1xf32> to vector<16x16xf32>
    %140 = vector.broadcast %138 : vector<1x16xf32> to vector<16x16xf32>
    %141 = arith.addf %139, %140 : vector<16x16xf32>
    %cst_62 = arith.constant 0.000000e+00 : f32
    %142 = vector.broadcast %cst_62 : f32 to vector<16x16xf32>
    %143 = arith.cmpf oge, %141, %142 : vector<16x16xf32>
    %cst_63 = arith.constant 2.000000e-01 : f32
    %144 = vector.broadcast %cst_63 : f32 to vector<16x16xf32>
    %145 = arith.mulf %144, %141 : vector<16x16xf32>
    %146 = arith.select %143, %141, %145 : vector<16x16xi1>, vector<16x16xf32>
    %cst_64 = arith.constant dense<0xFF800000> : vector<16xf32>
    %147 = vector.multi_reduction <maximumf>, %146, %cst_64 [1] : vector<16x16xf32> to vector<16xf32>
    %148 = vector.shape_cast %147 : vector<16xf32> to vector<16x1xf32>
    %149 = vector.broadcast %148 : vector<16x1xf32> to vector<16x16xf32>
    %150 = arith.subf %146, %149 : vector<16x16xf32>
    %151 = math.exp %150 : vector<16x16xf32>
    %152 = arith.mulf %151, %9 : vector<16x16xf32>
    %cst_65 = arith.constant dense<0.000000e+00> : vector<16xf32>
    %153 = vector.multi_reduction <add>, %152, %cst_65 [1] : vector<16x16xf32> to vector<16xf32>
    %154 = vector.shape_cast %153 : vector<16xf32> to vector<16x1xf32>
    %cst_66 = arith.constant 9.99999968E-21 : f32
    %155 = vector.broadcast %cst_66 : f32 to vector<16x1xf32>
    %156 = arith.maximumf %154, %155 : vector<16x1xf32>
    %157 = tpu.reciprocal %156 {approx = true} : vector<16x1xf32> -> vector<16x1xf32>
    %158 = vector.broadcast %157 : vector<16x1xf32> to vector<16x16xf32>
    %159 = arith.mulf %152, %158 : vector<16x16xf32>
    %160 = vector.extract_strided_slice %133 {offsets = [0, 0], sizes = [16, 32], strides = [1, 1]} : vector<16x64xf32> to vector<16x32xf32>
    %cst_67 = arith.constant dense<0.000000e+00> : vector<16x32xf32>
    %161 = tpu.matmul %159, %160, %cst_67 {dimension_numbers = #tpu.dot_dimension_numbers<[1], [0], [0], [1], [0, 0, 1, 1], [], []>} : vector<16x16xf32>, vector<16x32xf32>, vector<16x32xf32> -> vector<16x32xf32>
    %162 = vector.extract_strided_slice %135 {offsets = [0, 1], sizes = [16, 1], strides = [1, 1]} : vector<16x4xf32> to vector<16x1xf32>
    %163 = vector.extract_strided_slice %135 {offsets = [0, 3], sizes = [16, 1], strides = [1, 1]} : vector<16x4xf32> to vector<16x1xf32>
    %164 = tpu.transpose %162, [1, 0] : vector<16x1xf32> -> vector<1x16xf32>
    %165 = vector.broadcast %163 : vector<16x1xf32> to vector<16x16xf32>
    %166 = vector.broadcast %164 : vector<1x16xf32> to vector<16x16xf32>
    %167 = arith.addf %165, %166 : vector<16x16xf32>
    %cst_68 = arith.constant 0.000000e+00 : f32
    %168 = vector.broadcast %cst_68 : f32 to vector<16x16xf32>
    %169 = arith.cmpf oge, %167, %168 : vector<16x16xf32>
    %cst_69 = arith.constant 2.000000e-01 : f32
    %170 = vector.broadcast %cst_69 : f32 to vector<16x16xf32>
    %171 = arith.mulf %170, %167 : vector<16x16xf32>
    %172 = arith.select %169, %167, %171 : vector<16x16xi1>, vector<16x16xf32>
    %cst_70 = arith.constant dense<0xFF800000> : vector<16xf32>
    %173 = vector.multi_reduction <maximumf>, %172, %cst_70 [1] : vector<16x16xf32> to vector<16xf32>
    %174 = vector.shape_cast %173 : vector<16xf32> to vector<16x1xf32>
    %175 = vector.broadcast %174 : vector<16x1xf32> to vector<16x16xf32>
    %176 = arith.subf %172, %175 : vector<16x16xf32>
    %177 = math.exp %176 : vector<16x16xf32>
    %178 = arith.mulf %177, %9 : vector<16x16xf32>
    %cst_71 = arith.constant dense<0.000000e+00> : vector<16xf32>
    %179 = vector.multi_reduction <add>, %178, %cst_71 [1] : vector<16x16xf32> to vector<16xf32>
    %180 = vector.shape_cast %179 : vector<16xf32> to vector<16x1xf32>
    %cst_72 = arith.constant 9.99999968E-21 : f32
    %181 = vector.broadcast %cst_72 : f32 to vector<16x1xf32>
    %182 = arith.maximumf %180, %181 : vector<16x1xf32>
    %183 = tpu.reciprocal %182 {approx = true} : vector<16x1xf32> -> vector<16x1xf32>
    %184 = vector.broadcast %183 : vector<16x1xf32> to vector<16x16xf32>
    %185 = arith.mulf %178, %184 : vector<16x16xf32>
    %186 = vector.extract_strided_slice %133 {offsets = [0, 32], sizes = [16, 32], strides = [1, 1]} : vector<16x64xf32> to vector<16x32xf32>
    %cst_73 = arith.constant dense<0.000000e+00> : vector<16x32xf32>
    %187 = tpu.matmul %185, %186, %cst_73 {dimension_numbers = #tpu.dot_dimension_numbers<[1], [0], [0], [1], [0, 0, 1, 1], [], []>} : vector<16x16xf32>, vector<16x32xf32>, vector<16x32xf32> -> vector<16x32xf32>
    %188 = tpu.concatenate %161, %187 in 1 : vector<16x32xf32>, vector<16x32xf32> -> vector<16x64xf32>
    %c0_74 = arith.constant 0 : index
    %c0_75 = arith.constant 0 : index
    %189 = vector.load %arg14[%c0_74, %c0_75] : memref<1x64xf32, #tpu.memory_space<vmem>>, vector<1x64xf32>
    %190 = vector.broadcast %189 : vector<1x64xf32> to vector<16x64xf32>
    %191 = arith.addf %188, %190 : vector<16x64xf32>
    %cst_76 = arith.constant 0.000000e+00 : f32
    %192 = vector.broadcast %cst_76 : f32 to vector<16x64xf32>
    %193 = arith.maximumf %191, %192 : vector<16x64xf32>
    %194 = tpu.concatenate %193, %130 in 1 : vector<16x64xf32>, vector<16x3xf32> -> vector<16x67xf32>
    %c0_77 = arith.constant 0 : index
    %c0_78 = arith.constant 0 : index
    %195 = vector.load %arg15[%c0_77, %c0_78] : memref<67x6xf32, #tpu.memory_space<vmem>>, vector<67x6xf32>
    %cst_79 = arith.constant dense<0.000000e+00> : vector<16x6xf32>
    %196 = tpu.matmul %194, %195, %cst_79 {dimension_numbers = #tpu.dot_dimension_numbers<[1], [0], [0], [1], [0, 0, 1, 1], [], []>} : vector<16x67xf32>, vector<67x6xf32>, vector<16x6xf32> -> vector<16x6xf32>
    %c0_80 = arith.constant 0 : index
    %c0_81 = arith.constant 0 : index
    %197 = vector.load %arg16[%c0_80, %c0_81] : memref<6x2xf32, #tpu.memory_space<vmem>>, vector<6x2xf32>
    %cst_82 = arith.constant dense<0.000000e+00> : vector<16x2xf32>
    %198 = tpu.matmul %196, %197, %cst_82 {dimension_numbers = #tpu.dot_dimension_numbers<[1], [0], [0], [1], [0, 0, 1, 1], [], []>} : vector<16x6xf32>, vector<6x2xf32>, vector<16x2xf32> -> vector<16x2xf32>
    %199 = vector.extract_strided_slice %198 {offsets = [0, 0], sizes = [16, 1], strides = [1, 1]} : vector<16x2xf32> to vector<16x1xf32>
    %200 = vector.extract_strided_slice %198 {offsets = [0, 1], sizes = [16, 1], strides = [1, 1]} : vector<16x2xf32> to vector<16x1xf32>
    %201 = tpu.transpose %199, [1, 0] : vector<16x1xf32> -> vector<1x16xf32>
    %202 = vector.broadcast %200 : vector<16x1xf32> to vector<16x16xf32>
    %203 = vector.broadcast %201 : vector<1x16xf32> to vector<16x16xf32>
    %204 = arith.addf %202, %203 : vector<16x16xf32>
    %cst_83 = arith.constant 0.000000e+00 : f32
    %205 = vector.broadcast %cst_83 : f32 to vector<16x16xf32>
    %206 = arith.cmpf oge, %204, %205 : vector<16x16xf32>
    %cst_84 = arith.constant 2.000000e-01 : f32
    %207 = vector.broadcast %cst_84 : f32 to vector<16x16xf32>
    %208 = arith.mulf %207, %204 : vector<16x16xf32>
    %209 = arith.select %206, %204, %208 : vector<16x16xi1>, vector<16x16xf32>
    %cst_85 = arith.constant dense<0xFF800000> : vector<16xf32>
    %210 = vector.multi_reduction <maximumf>, %209, %cst_85 [1] : vector<16x16xf32> to vector<16xf32>
    %211 = vector.shape_cast %210 : vector<16xf32> to vector<16x1xf32>
    %212 = vector.broadcast %211 : vector<16x1xf32> to vector<16x16xf32>
    %213 = arith.subf %209, %212 : vector<16x16xf32>
    %214 = math.exp %213 : vector<16x16xf32>
    %215 = arith.mulf %214, %9 : vector<16x16xf32>
    %cst_86 = arith.constant dense<0.000000e+00> : vector<16xf32>
    %216 = vector.multi_reduction <add>, %215, %cst_86 [1] : vector<16x16xf32> to vector<16xf32>
    %217 = vector.shape_cast %216 : vector<16xf32> to vector<16x1xf32>
    %cst_87 = arith.constant 9.99999968E-21 : f32
    %218 = vector.broadcast %cst_87 : f32 to vector<16x1xf32>
    %219 = arith.maximumf %217, %218 : vector<16x1xf32>
    %220 = tpu.reciprocal %219 {approx = true} : vector<16x1xf32> -> vector<16x1xf32>
    %221 = vector.broadcast %220 : vector<16x1xf32> to vector<16x16xf32>
    %222 = arith.mulf %215, %221 : vector<16x16xf32>
    %cst_88 = arith.constant dense<0.000000e+00> : vector<16x6xf32>
    %223 = tpu.matmul %222, %196, %cst_88 {dimension_numbers = #tpu.dot_dimension_numbers<[1], [0], [0], [1], [0, 0, 1, 1], [], []>} : vector<16x16xf32>, vector<16x6xf32>, vector<16x6xf32> -> vector<16x6xf32>
    %c0_89 = arith.constant 0 : index
    %c0_90 = arith.constant 0 : index
    %224 = vector.load %arg17[%c0_89, %c0_90] : memref<1x6xf32, #tpu.memory_space<vmem>>, vector<1x6xf32>
    %225 = vector.broadcast %224 : vector<1x6xf32> to vector<16x6xf32>
    %226 = arith.addf %223, %225 : vector<16x6xf32>
    %c0_91 = arith.constant 0 : index
    %c0_92 = arith.constant 0 : index
    %227 = vector.load %arg19[%c0_91, %c0_92] : memref<16x6xf32, #tpu.memory_space<vmem>>, vector<16x6xf32>
    tpu.vector_store %arg19[%c0_91, %c0_92], %226 {strides = array<i32>} : memref<16x6xf32, #tpu.memory_space<vmem>>, vector<16x6xf32>,
    return
  }
}

</mosaic_0001>

<bundles_post_ra>
// kernel: tpu_custom_call.1
= control target key start
LH: loop header
LB: loop body
LE: loop exit
PB: predicated region body
PF: predicated region fallthrough
CT: control target
= control target key end

     0   :  { %s3019_s0 = inlined_call_operand.vmem [shape: f32[16,9], index: 0, kind: input, shape index: {}]   ;;  %s3020_s1 = inlined_call_operand.vmem [shape: f32[16,16], index: 1, kind: input, shape index: {}]   ;;  %s3021_s2 = inlined_call_operand.vmem [shape: f32[2,16], index: 2, kind: input, shape index: {}]   ;;  %s3022_s3 = inlined_call_operand.vmem [shape: f32[16,2], index: 3, kind: input, shape index: {}]   ;;  %s3023_s4 = inlined_call_operand.vmem [shape: f32[16,3], index: 4, kind: input, shape index: {}]   ;;  %s3024_s5 = inlined_call_operand.vmem [shape: f32[16,16], index: 5, kind: input, shape index: {}]   ;;  %s3025_s6 = inlined_call_operand.vmem [shape: f32[9,64], index: 6, kind: input, shape index: {}]   ;;  %s3026_s7 = inlined_call_operand.vmem [shape: f32[64,4], index: 7, kind: input, shape index: {}]   ;;  %s3027_s8 = inlined_call_operand.vmem [shape: f32[1,64], index: 8, kind: input, shape index: {}]   ;;  %s3028_s9 = inlined_call_operand.vmem [shape: f32[64,16], index: 9, kind: input, shape index: {}]   ;;  %s3029_s10 = inlined_call_operand.vmem [shape: f32[16,2], index: 10, kind: input, shape index: {}]   ;;  %s3030_s11 = inlined_call_operand.vmem [shape: f32[1,16], index: 11, kind: input, shape index: {}]   ;;  %s3031_s12 = inlined_call_operand.vmem [shape: f32[19,64], index: 12, kind: input, shape index: {}]   ;;  %s3032_s13 = inlined_call_operand.vmem [shape: f32[64,4], index: 13, kind: input, shape index: {}]   ;;  %s3033_s14 = inlined_call_operand.vmem [shape: f32[1,64], index: 14, kind: input, shape index: {}]   ;;  %s3034_s15 = inlined_call_operand.vmem [shape: f32[67,6], index: 15, kind: input, shape index: {}]   ;;  %s3035_s16 = inlined_call_operand.vmem [shape: f32[6,2], index: 16, kind: input, shape index: {}]   ;;  %s3036_s17 = inlined_call_operand.vmem [shape: f32[1,6], index: 17, kind: input, shape index: {}]   ;;  %s3037_s18 = inlined_call_operand.hbm [shape: f32[2,16], index: 18, kind: output, shape index: {0}]   ;;  %s3038_s19 = inlined_call_operand.vmem [shape: f32[16,6], index: 19, kind: output, shape index: {1}]  }
   0x1   :  { %3042 = sst [smem:[#allocation5_spill]] %s3019_s0 }
   0x2   :  { %3043 = sst [smem:[#allocation6_spill]] %s3020_s1 }
   0x3   :  { %3044 = sst [smem:[#allocation7_spill]] %s3021_s2 }
   0x4   :  { %3045 = sst [smem:[#allocation8_spill]] %s3022_s3 }
   0x5   :  { %v80_v0 = vld [vmem:[%s3025_s6] sm:$0xff]  ;;  %v81_v1 = vld [vmem:[%s3025_s6 + $0x8] sm:$0x1]  ;;  %vm89_vm0 = vcmask 1040384   ;;  %s3046_s2 = sld [smem:[#allocation5_spill]]  ;;  %vm2566_vm1 = vmmov 1  }
   0x6   :  { %v2358_v3 = vpack.c.bf16 %v81_v1, %v80_v0  ;;  %vm2359_vm2 = vmpackc.low %vm89_vm0, %vm2566_vm1  ;;  %vm82_vm3 = vcmask 72704   ;;  %v168_v4 = vld [vmem:[%s3026_s7] sm:$0xff]  ;;  %v169_v5 = vld [vmem:[%s3026_s7 + $0x8] sm:$0xff] }
   0x7   :  { %v170_v6 = vld [vmem:[%s3026_s7 + $0x10] sm:$0xff]  ;;  %v171_v7 = vld [vmem:[%s3026_s7 + $0x18] sm:$0xff]  ;;  %v2364_v8 = vpack.c.bf16 %v169_v5, %v168_v4 }
   0x8   :  { %2360 = vmatprep.subr.msk.bf16.mxu1 %vm2359_vm2, %v2358_v3 }
   0x9   :  { %2363 = vmatpush3.bf16.msk.msra.mxu1 %vm2359_vm2, %v2358_v3 }
   0xb   :  { %v78_v2 = vld [vmem:[%s3046_s2] sm:$0xff]  ;;  %v79_v9 = vld [vmem:[%s3046_s2 + $0x8] sm:$0xff] }
   0xc   :  { %2209 = vmatprep.mubr.msk.f32.mxu1 %vm82_vm3, %v78_v2 }
   0xd   :  { %25 = vsyncpa [#allocation3], 0  ;;  %2365 = vmatprep.subr.bf16.mxu1 %v2364_v8  ;;  %v2368_v10 = vpack.c.bf16 %v171_v7, %v170_v6  ;;  %v172_v11 = vld [vmem:[%s3026_s7 + $0x20] sm:$0xff]  ;;  %v173_v12 = vld [vmem:[%s3026_s7 + $0x28] sm:$0xff]  ;;  %2210 = vmatmul.mubr.msk.f32.vlgmr.msra.gmra.mrb[0].mxu1 %vm82_vm3, %v79_v9  ;;  %v2567_v17 = vmov 2   ;;  %vm176_vm4 = vcmask 523264   ;;  %v300_v28 = vlaneseq }
   0xe   :  { %2367 = vmatpush3.bf16.msra.mxu1 %v2364_v8  ;;  %v2372_v13 = vpack.c.bf16 %v173_v12, %v172_v11  ;;  %v174_v14 = vld [vmem:[%s3026_s7 + $0x30] sm:$0xff]  ;;  %v175_v15 = vld [vmem:[%s3026_s7 + $0x38] sm:$0xff]  ;;  %2472 = vset.pattern.permute.xlu1 %v2567_v17  ;;  %v2568_v22 = vmov 3   ;;  %s2569_s7 = smov 127   ;;  %vm312_vm5 = vcmask 130048   ;;  %s3047_s6 = sld [smem:[#allocation6_spill]] }
   0xf   :  { %2369 = vmatprep.subr.bf16.mxu1 %v2368_v10  ;;  %v2376_v16 = vpack.c.bf16 %v175_v15, %v174_v14  ;;  %2475 = vset.pattern.permute.xlu0 %v2568_v22  ;;  %v301_v30 = vshrl.u32 %v300_v28, 7  ;;  %v2570_v62 = vmov 0.0   ;;  %s2571_s28 = smov 96   ;;  %s2572_s1 = smov 32   ;;  %vm599_vm12 = vcmask 261120  }
  0x10   :  { %s3048_s23 = sld [smem:[#allocation7_spill]]  ;;  %s3049_s25 = sld [smem:[#allocation8_spill]] }
  0x11   :  { %v2733_v32 = vsub.s32 0, %v301_v30  ;;  %s2575_s30 = smov 16  }
  0x12   :  { %2371 = vmatpush3.bf16.msra.mxu1 %v2368_v10 }
  0x13   :  { %2373 = vmatprep.subr.bf16.mxu1 %v2372_v13 }
  0x14   :  { %v63_v60 = vld [vmem:[%s3047_s6 + $0x8] sm:$0xff]  ;;  %v62_v61 = vld [vmem:[%s3047_s6] sm:$0xff] }
  0x15   :  { %vm65_vm10 = vcmp.gt.f32.partialorder %v63_v60, 0.0  ;;  %vm64_vm11 = vcmp.gt.f32.partialorder %v62_v61, 0.0  ;;  %v2091_v61 = vld [vmem:[%s3027_s8] ss:$0 sm:$0xff] }
  0x16   :  { %2375 = vmatpush3.bf16.msra.mxu1 %v2372_v13  ;;  %v2748_v63 = vsel %vm65_vm10, 1.0, %v2570_v62  ;;  %v2751_v0 = vsel %vm64_vm11, 1.0, %v2570_v62  ;;  %vm1079_vm11 = vcmask 1041408  }
  0x17   :  { %2377 = vmatprep.subr.bf16.mxu1 %v2376_v16 }
  0x1a   :  { %2379 = vmatpush3.bf16.msra.mxu1 %v2376_v16 }
  0xe0   :  { %v2716_v18 = vpop.f32.mrb[0].mxu1 }
  0xe1   :  { %v2718_v19 = vpop.f32.mrb[1].mxu1 }
  0xe2   :  { %v2476_v20 = vpack.i.bf16 %v2716_v18, %v2718_v19  ;;  %2228 = vmatprep.mubr.msk.f32.mxu1 %vm176_vm4, %v2718_v19  ;;  %v2380_v21 = vpack.c.bf16 %v2716_v18, %v2718_v19 }
  0xe3   :  { %2229 = vmatmul.mubr.msk.f32.vlgmr.msra.gmra.mrb[2].mxu1 %vm176_vm4, %v2716_v18 }
  0xe4   :  { %2381 = vmatprep.subr.bf16.mxu0 %v2380_v21 }
  0xe5   :  { %2383 = vmatpush3.bf16.msra.mxu0 %v2380_v21 }
 0x1b6   :  { %v2230_v23 = vpop.f32.mrb[2].mxu1 }
 0x1b7   :  { %297 = vperm.xlu1 %2472, %v2230_v23   ;;  %v249_v24 = vpop.f32.mrb[3].mxu1 }
 0x1b8   :  { %420 = vrot.lane.b32.xlu0 %v249_v24, %s2569_s7 }
 0x1bb   :  { %2473 = vset.pattern.permute.xlu1 %v2568_v22 }
 0x1bc   :  { %463 = vperm.xlu1 %2473, %v2230_v23   ;;  %422 = vrot.lane.b32.xlu0 %v2230_v23, %s2569_s7 }
 0x1c0   :  { %2474 = vset.pattern.permute.xlu1 %v2567_v17  ;;  %459 = vperm.xlu0 %2475, %v249_v24  }
 0x1c1   :  { %292 = vperm.xlu1 %2474, %v249_v24  }
 0x1ea   :  { %258 = vxpose.xlu1.b32.start [1/2] (short) (narrow) %v249_v24, 8 }
 0x1ee   :  { %259 = vxpose.xlu1.b32.end [2/2] (short) (narrow) %v2230_v23, 8 }
 0x22a   :  { %v421_v25 = vpop.permute.xlu0 %420 }
 0x22b   :  { %426 = vxpose.xlu0.b32.start [1/2] (short) (narrow) %v421_v25, 8 }
 0x22e   :  { %v423_v26 = vpop.permute.xlu0 %422 }
 0x22f   :  { %427 = vxpose.xlu0.b32.end [2/2] (short) (narrow) %v423_v26, 8 }
 0x236   :  { %v298_v27 = vpop.permute.xlu1 %297 }
 0x23b   :  { %v464_v29 = vpop.permute.xlu1 %463 }
 0x23f   :  { %v460_v43 = vpop.permute.xlu0 %459 }
 0x240   :  { %v293_v31 = vpop.permute.xlu1 %292 }
 0x26a   :  { %v274_v33 = vpop.trf.xlu1 }
 0x26b   :  { %v303_v34 = vrot.slane %v274_v33, %v2733_v32 }
 0x26d   :  { %v304_v35 = vadd.f32 %v303_v34, %v293_v31  ;;  %v305_v36 = vadd.f32 %v303_v34, %v298_v27 }
 0x26f   :  { %vm307_vm6 = vcmp.ge.f32.partialorder %v305_v36, 0.0  ;;  %v309_v37 = vmul.f32 0.2, %v305_v36  ;;  %vm306_vm7 = vcmp.ge.f32.partialorder %v304_v35, 0.0  ;;  %v308_v38 = vmul.f32 0.2, %v304_v35 }
 0x271   :  { %v311_v39 = vsel %vm307_vm6, %v305_v36, %v309_v37  ;;  %v310_v40 = vsel %vm306_vm7, %v304_v35, %v308_v38  ;;  %vm1072_vm6 = vcmask 15360  }
 0x272   :  { %v316_v41 = vsel %vm312_vm5, %v311_v39, -inf  ;;  %v313_v42 = vsel %vm312_vm5, %v310_v40, -inf }
 0x273   :  { %317 = vmax.xlane.f32.xlu1 %v316_v41  ;;  %314 = vmax.xlane.f32.xlu0 %v313_v42  ;;  %v613_v42 = vld [vmem:[%s3028_s9] sm:$0xff] }
 0x2ab   :  { %v442_v44 = vpop.trf.xlu0 }
 0x2ac   :  { %v469_v45 = vrot.slane %v442_v44, %v2733_v32  ;;  %v615_v44 = vld [vmem:[%s3028_s9 + $0x10] sm:$0xff] }
 0x2ae   :  { %v470_v46 = vadd.f32 %v469_v45, %v460_v43  ;;  %v471_v47 = vadd.f32 %v469_v45, %v464_v29  ;;  %v614_v43 = vld [vmem:[%s3028_s9 + $0x8] sm:$0xff] }
 0x2af   :  { %v2388_v45 = vpack.c.bf16 %v614_v43, %v613_v42 }
 0x2b0   :  { %vm473_vm8 = vcmp.ge.f32.partialorder %v471_v47, 0.0  ;;  %v475_v48 = vmul.f32 0.2, %v471_v47  ;;  %vm472_vm9 = vcmp.ge.f32.partialorder %v470_v46, 0.0  ;;  %v474_v49 = vmul.f32 0.2, %v470_v46 }
 0x2b2   :  { %v477_v50 = vsel %vm473_vm8, %v471_v47, %v475_v48  ;;  %v476_v51 = vsel %vm472_vm9, %v470_v46, %v474_v49  ;;  %v616_v46 = vld [vmem:[%s3028_s9 + $0x18] sm:$0xff] }
 0x2b3   :  { %v481_v52 = vsel %vm312_vm5, %v477_v50, -inf  ;;  %v478_v53 = vsel %vm312_vm5, %v476_v51, -inf  ;;  %v2392_v47 = vpack.c.bf16 %v616_v46, %v615_v44  ;;  %v2574_v44 = vmov 0  }
 0x2b4   :  { %482 = vmax.xlane.f32.xlu1 %v481_v52  ;;  %479 = vmax.xlane.f32.xlu0 %v478_v53  ;;  %v619_v53 = vld [vmem:[%s3028_s9 + $0x30] sm:$0xff] }
 0x300   :  { %v318_v54 = vpop.xlane.xlu1 %317  ;;  %v315_v55 = vpop.xlane.xlu0 %314 }
 0x301   :  { %v320_v56 = vsub.f32 %v311_v39, %v318_v54  ;;  %v319_v57 = vsub.f32 %v310_v40, %v315_v55  ;;  %v620_v54 = vld [vmem:[%s3028_s9 + $0x38] sm:$0xff] }
 0x302   :  { %v2400_v55 = vpack.c.bf16 %v620_v54, %v619_v53 }
 0x303   :  { %v323_v58 = vmul.f32 1.442695, %v320_v56  ;;  %v321_v59 = vmul.f32 1.442695, %v319_v57  ;;  %v702_v56 = vld [vmem:[%s3029_s10] sm:$0xff]  ;;  %v703_v57 = vld [vmem:[%s3029_s10 + $0x8] sm:$0xff] }
 0x305   :  { %2494 = vpow2.f32 %v323_v58  ;;  %v2404_v58 = vpack.c.bf16 %v703_v57, %v702_v56 }
 0x306   :  { %2496 = vpow2.f32 %v321_v59 }
 0x307   :  { %2405 = vmatprep.subr.bf16.mxu1 %v2404_v58 }
 0x308   :  { %2407 = vmatpush3.bf16.msra.mxu1 %v2404_v58 }
 0x30f   :  { %v2495_v1 = vpop.eup %2494 }
 0x310   :  { %v2497_v2 = vpop.eup %2496  ;;  %v326_v3 = vmul.f32 %v2495_v1, %v2748_v63 }
 0x311   :  { %v325_v4 = vmul.f32 %v2497_v2, %v2751_v0 }
 0x312   :  { %v330_v5 = vsel %vm312_vm5, %v326_v3, 0.0 }
 0x313   :  { %331 = vadd.xlane.f32.xlu1 %v330_v5  ;;  %v327_v6 = vsel %vm312_vm5, %v325_v4, 0.0 }
 0x314   :  { %328 = vadd.xlane.f32.xlu0 %v327_v6 }
 0x341   :  { %v483_v7 = vpop.xlane.xlu1 %482  ;;  %v480_v8 = vpop.xlane.xlu0 %479 }
 0x342   :  { %v485_v9 = vsub.f32 %v477_v50, %v483_v7  ;;  %v484_v10 = vsub.f32 %v476_v51, %v480_v8  ;;  %v617_v50 = vld [vmem:[%s3028_s9 + $0x20] sm:$0xff]  ;;  %v618_v51 = vld [vmem:[%s3028_s9 + $0x28] sm:$0xff] }
 0x343   :  { %v2396_v52 = vpack.c.bf16 %v618_v51, %v617_v50 }
 0x344   :  { %v488_v11 = vmul.f32 1.442695, %v485_v9  ;;  %v486_v12 = vmul.f32 1.442695, %v484_v10  ;;  %v2573_v9 = vmov 1  }
 0x345   :  { %2482 = vset.pattern.permute.xlu1 %v2573_v9  ;;  %2481 = vset.pattern.permute.xlu0 %v2573_v9 }
 0x346   :  { %2498 = vpow2.f32 %v488_v11 }
 0x347   :  { %2500 = vpow2.f32 %v486_v12 }
 0x350   :  { %v2499_v13 = vpop.eup %2498 }
 0x351   :  { %v2501_v14 = vpop.eup %2500  ;;  %v491_v15 = vmul.f32 %v2499_v13, %v2748_v63 }
 0x352   :  { %v490_v16 = vmul.f32 %v2501_v14, %v2751_v0 }
 0x353   :  { %v495_v21 = vsel %vm312_vm5, %v491_v15, 0.0 }
 0x354   :  { %496 = vadd.xlane.f32.xlu1 %v495_v21  ;;  %v492_v23 = vsel %vm312_vm5, %v490_v16, 0.0 }
 0x355   :  { %493 = vadd.xlane.f32.xlu0 %v492_v23 }
 0x36b   :  { %2477 = vrot.lane.b32.xlu0 %v2476_v20, %s2571_s28 }
 0x3a0   :  { %v332_v24 = vpop.xlane.xlu1 %331 }
 0x3a1   :  { %v334_v25 = vmax.f32 %v332_v24, 1e-20  ;;  %v329_v26 = vpop.xlane.xlu0 %328 }
 0x3a2   :  { %v333_v27 = vmax.f32 %v329_v26, 1e-20 }
 0x3a3   :  { %2502 = vrcp.f32 %v334_v25 }
 0x3a4   :  { %2504 = vrcp.f32 %v333_v27 }
 0x3ad   :  { %v2503_v28 = vpop.eup %2502 }
 0x3ae   :  { %v2505_v29 = vpop.eup %2504  ;;  %v338_v30 = vmul.f32 %v2503_v28, %v326_v3 }
 0x3af   :  { %v337_v31 = vmul.f32 %v2505_v29, %v325_v4 }
 0x3b1   :  { %2235 = vmatprep.mubr.msk.f32.mxu0 %vm312_vm5, %v337_v31 }
 0x3b2   :  { %2236 = vmatmul.mubr.msk.f32.vlgmr.msra.gmra.mrb[0].mxu0 %vm312_vm5, %v338_v30 }
 0x3e1   :  { %v497_v33 = vpop.xlane.xlu1 %496 }
 0x3e2   :  { %v499_v34 = vmax.f32 %v497_v33, 1e-20  ;;  %v494_v35 = vpop.xlane.xlu0 %493  ;;  %v953_v33 = vld [vmem:[%s3048_s23] sm:$0x3] }
 0x3e3   :  { %v498_v36 = vmax.f32 %v494_v35, 1e-20 }
 0x3e4   :  { %2506 = vrcp.f32 %v499_v34 }
 0x3e5   :  { %2508 = vrcp.f32 %v498_v36 }
 0x3e6   :  { %v2478_v18 = vpop.permute.xlu0 %2477 }
 0x3e7   :  { %v2480_v19 = vunpack.i.h.bf16 %v2478_v18  ;;  %v2479_v20 = vunpack.i.l.bf16 %v2478_v18 }
 0x3e9   :  { %v2384_v37 = vpack.c.bf16 %v2480_v19, %v2479_v20 }
 0x3eb   :  { %2385 = vmatprep.subr.bf16.mxu0 %v2384_v37 }
 0x3ec   :  { %2387 = vmatpush3.bf16.msra.mxu0 %v2384_v37 }
 0x3ed   :  { %2389 = vmatprep.subr.bf16.mxu0 %v2388_v45 }
 0x3ee   :  { %v2507_v38 = vpop.eup %2506 }
 0x3ef   :  { %v2509_v39 = vpop.eup %2508  ;;  %v503_v40 = vmul.f32 %v2507_v38, %v491_v15 }
 0x3f0   :  { %v502_v41 = vmul.f32 %v2509_v39, %v490_v16 }
 0x3f2   :  { %2242 = vmatprep.mubr.msk.f32.mxu0 %vm312_vm5, %v502_v41 }
 0x3f3   :  { %2243 = vmatmul.mubr.msk.f32.vlgmr.msra.gmra.mrb[2].mxu0 %vm312_vm5, %v503_v40 }
 0x3f4   :  { %2391 = vmatpush3.bf16.msra.mxu0 %v2388_v45 }
 0x3f5   :  { %2393 = vmatprep.subr.bf16.mxu0 %v2392_v47 }
 0x3f8   :  { %2395 = vmatpush3.bf16.msra.mxu0 %v2392_v47 }
 0x3f9   :  { %2397 = vmatprep.subr.bf16.mxu0 %v2396_v52 }
 0x3fc   :  { %2399 = vmatpush3.bf16.msra.mxu0 %v2396_v52 }
 0x3fd   :  { %2401 = vmatprep.subr.bf16.mxu0 %v2400_v55 }
 0x400   :  { %2403 = vmatpush3.bf16.msra.mxu0 %v2400_v55 }
 0x485   :  { %v2237_v48 = vpop.f32.mrb[0].mxu0 }
 0x486   :  { %v411_v49 = vpop.f32.mrb[1].mxu0 }
 0x4c6   :  { %v2244_v59 = vpop.f32.mrb[2].mxu0 }
 0x4c7   :  { %v582_v60 = vpop.f32.mrb[3].mxu0 }
 0x4c8   :  { %593 = vrot.lane.b32.xlu1 %v582_v60, %s2572_s1  ;;  %v2832_v60 = vld [vmem:[%s3023_s4] sm:$0xff] }
 0x4cc   :  { %595 = vrot.lane.b32.xlu1 %v2244_v59, %s2572_s1  ;;  %v1070_v59 = vld [vmem:[%s3049_s25] sm:$0xff] }
 0x53a   :  { %v594_v1 = vpop.permute.xlu1 %593 }
 0x53b   :  { %v600_v2 = vsel %vm599_vm12, %v411_v49, %v594_v1  ;;  %v1170_v1 = vld [vmem:[%s3031_s12] sm:$0xff] }
 0x53c   :  { %v609_v3 = vadd.f32 %v2091_v61, %v600_v2  ;;  %v1171_v2 = vld [vmem:[%s3031_s12 + $0x8] sm:$0xff] }
 0x53e   :  { %v611_v4 = vmax.f32 %v609_v3, 0.0  ;;  %v596_v5 = vpop.permute.xlu1 %595  ;;  %v2412_v3 = vpack.c.bf16 %v1171_v2, %v1170_v1 }
 0x53f   :  { %v601_v6 = vsel %vm599_vm12, %v2237_v48, %v596_v5 }
 0x540   :  { %v610_v7 = vadd.f32 %v2091_v61, %v601_v6  ;;  %2261 = vmatprep.mubr.msk.f32.mxu0 %vm176_vm4, %v611_v4  ;;  %v2837_v61 = vld [vmem:[%s3023_s4 + $0x8] sm:$0xff]  ;;  %2413 = vmatprep.subr.bf16.mxu0 %v2412_v3  ;;  %s2576_s4 = smov 64  }
 0x542   :  { %v612_v8 = vmax.f32 %v610_v7, 0.0  ;;  %v2096_v7 = vld [vmem:[%s3030_s11] ss:$0 sm:$0xff] }
 0x544   :  { %2262 = vmatmul.mubr.msk.f32.vlgmr.msra.gmra.mrb[4].mxu0 %vm176_vm4, %v612_v8 }
 0x545   :  { %2415 = vmatpush3.bf16.msra.mxu0 %v2412_v3 }
 0x617   :  { %v2263_v10 = vpop.f32.mrb[4].mxu0 }
 0x618   :  { %v693_v11 = vpop.f32.mrb[5].mxu0 }
 0x619   :  { %v2408_v12 = vpack.c.bf16 %v2263_v10, %v693_v11  ;;  %2268 = vmatprep.mubr.msk.f32.mxu1 %vm312_vm5, %v693_v11 }
 0x61a   :  { %2269 = vmatmul.mubr.msk.f32.vlgmr.msra.gmra.mrb[4].mxu1 %vm312_vm5, %v2263_v10 }
 0x61b   :  { %2409 = vmatprep.subr.bf16.mxu1 %v2408_v12 }
 0x61c   :  { %2411 = vmatpush3.bf16.msra.mxu1 %v2408_v12 }
 0x6ed   :  { %v2270_v13 = vpop.f32.mrb[4].mxu1 }
 0x6ee   :  { %824 = vperm.xlu1 %2482, %v2270_v13   ;;  %v776_v14 = vpop.f32.mrb[5].mxu1 }
 0x6ef   :  { %819 = vperm.xlu0 %2481, %v776_v14  }
 0x717   :  { %785 = vxpose.xlu1.b32.start [1/2] (short) (narrow) %v776_v14, 8 }
 0x71b   :  { %786 = vxpose.xlu1.b32.end [2/2] (short) (narrow) %v2270_v13, 8 }
 0x71f   :  { %954 = vxpose.xlu1.b32.start.end [1/1] (short) (narrow) %v953_v33, 16 }
 0x73d   :  { %2483 = vset.pattern.permute.xlu1 %v2574_v44 }
 0x76d   :  { %v825_v15 = vpop.permute.xlu1 %824 }
 0x76e   :  { %v820_v23 = vpop.permute.xlu0 %819 }
 0x797   :  { %v801_v16 = vpop.trf.xlu1 }
 0x798   :  { %v830_v21 = vrot.slane %v801_v16, %v2733_v32 }
 0x79a   :  { %v831_v24 = vadd.f32 %v830_v21, %v820_v23  ;;  %v832_v25 = vadd.f32 %v830_v21, %v825_v15 }
 0x79c   :  { %vm833_vm13 = vcmp.ge.f32.partialorder %v831_v24, 0.0  ;;  %v835_v26 = vmul.f32 0.2, %v831_v24  ;;  %v836_v27 = vmul.f32 0.2, %v832_v25  ;;  %vm834_vm14 = vcmp.ge.f32.partialorder %v832_v25, 0.0 }
 0x79e   :  { %v837_v28 = vsel %vm833_vm13, %v831_v24, %v835_v26  ;;  %v838_v30 = vsel %vm834_vm14, %v832_v25, %v836_v27  ;;  %vm1068_vm13 = vcmask 123904   ;;  %vm1180_vm14 = vcmask 1042432  }
 0x79f   :  { %v839_v29 = vsel %vm312_vm5, %v837_v28, -inf  ;;  %v842_v31 = vsel %vm312_vm5, %v838_v30, -inf  ;;  %v970_v43 = vpop.trf.xlu1 }
 0x7a0   :  { %840 = vmax.xlane.f32.xlu0 %v839_v29  ;;  %vm986_vm15 = vcmp.gt.f32.partialorder %v970_v43, 0.0  ;;  %v1260_v43 = vld [vmem:[%s3032_s13 + $0x8] sm:$0xff] }
 0x7a1   :  { %v988_v45 = vsel %vm986_vm15, 1, %v2574_v44 }
 0x7a2   :  { %991 = vperm.xlu1 %2483, %v988_v45  }
 0x7a3   :  { %v971_v46 = vpop.trf.xlu1 }
 0x7a4   :  { %843 = vmax.xlane.f32.xlu0 %v842_v31  ;;  %vm987_vm1 = vcmp.gt.f32.partialorder %v971_v46, 0.0  ;;  %v1262_v46 = vld [vmem:[%s3032_s13 + $0x18] sm:$0xff] }
 0x7a5   :  { %v989_v47 = vsel %vm987_vm1, 1, %v2574_v44 }
 0x7a6   :  { %994 = vperm.xlu1 %2483, %v989_v47  }
 0x821   :  { %v992_v4 = vpop.permute.xlu1 %991 }
 0x822   :  { %vm996_vm9 = vcmp.eq.s32.totalorder %v992_v4, 1 }
 0x825   :  { %v995_v5 = vpop.permute.xlu1 %994 }
 0x826   :  { %vm997_vm7 = vcmp.eq.s32.totalorder %v995_v5, 1 }
 0x82d   :  { %v841_v34 = vpop.xlane.xlu0 %840 }
 0x82e   :  { %v845_v35 = vsub.f32 %v837_v28, %v841_v34 }
 0x830   :  { %v847_v36 = vmul.f32 1.442695, %v845_v35 }
 0x831   :  { %v844_v18 = vpop.xlane.xlu0 %843 }
 0x832   :  { %2510 = vpow2.f32 %v847_v36  ;;  %v846_v19 = vsub.f32 %v838_v30, %v844_v18 }
 0x834   :  { %v849_v20 = vmul.f32 1.442695, %v846_v19 }
 0x836   :  { %2512 = vpow2.f32 %v849_v20 }
 0x83c   :  { %v2511_v37 = vpop.eup %2510 }
 0x83d   :  { %v851_v38 = vmul.f32 %v2511_v37, %v2751_v0  ;;  %v1010_v0 = vrot.slane %v953_v33, 1 }
 0x83f   :  { %v853_v39 = vsel %vm312_vm5, %v851_v38, 0.0 }
 0x840   :  { %v2513_v40 = vpop.eup %2512  ;;  %854 = vadd.xlane.f32.xlu0 %v853_v39 }
 0x841   :  { %v852_v41 = vmul.f32 %v2513_v40, %v2748_v63  ;;  %v1071_v40 = vld [vmem:[%s3049_s25 + $0x8] sm:$0xff] }
 0x843   :  { %v856_v42 = vsel %vm312_vm5, %v852_v41, 0.0 }
 0x844   :  { %857 = vadd.xlane.f32.xlu0 %v856_v42  ;;  %v1259_v42 = vld [vmem:[%s3032_s13] sm:$0xff] }
 0x845   :  { %v2416_v45 = vpack.c.bf16 %v1260_v43, %v1259_v42 }
 0x871   :  { %1012 = vxpose.xlu0.b32.start.end [1/1] (short) (narrow) %v1010_v0, 16  ;;  %v1263_v0 = vld [vmem:[%s3032_s13 + $0x20] sm:$0xff] }
 0x89e   :  { %1162 = vrot.lane.b32.xlu0 %v2832_v60, %s2575_s30 }
 0x8cd   :  { %v855_v48 = vpop.xlane.xlu0 %854 }
 0x8ce   :  { %v859_v49 = vmax.f32 %v855_v48, 1e-20  ;;  %v1264_v48 = vld [vmem:[%s3032_s13 + $0x28] sm:$0xff] }
 0x8d0   :  { %2514 = vrcp.f32 %v859_v49  ;;  %v2424_v49 = vpack.c.bf16 %v1264_v48, %v1263_v0 }
 0x8d1   :  { %v858_v50 = vpop.xlane.xlu0 %857 }
 0x8d2   :  { %v860_v63 = vmax.f32 %v858_v50, 1e-20  ;;  %v1265_v50 = vld [vmem:[%s3032_s13 + $0x30] sm:$0xff] }
 0x8d4   :  { %2516 = vrcp.f32 %v860_v63  ;;  %v1266_v63 = vld [vmem:[%s3032_s13 + $0x38] sm:$0xff] }
 0x8da   :  { %v2515_v51 = vpop.eup %2514 }
 0x8db   :  { %v863_v52 = vmul.f32 %v2515_v51, %v851_v38  ;;  %v2428_v51 = vpack.c.bf16 %v1266_v63, %v1265_v50 }
 0x8dd   :  { %2275 = vmatprep.mubr.msk.f32.mxu1 %vm312_vm5, %v863_v52 }
 0x8de   :  { %v2517_v53 = vpop.eup %2516 }
 0x8df   :  { %v864_v54 = vmul.f32 %v2517_v53, %v852_v41  ;;  %v1172_v41 = vld [vmem:[%s3031_s12 + $0x10] sm:$0x7] }
 0x8e0   :  { %2287 = vmatprep.subr.msk.mxu0 %vm1180_vm14, %v1172_v41 }
 0x8e1   :  { %2276 = vmatmul.mubr.msk.f32.vlgmr.msra.gmra.mrb[6].mxu1 %vm312_vm5, %v864_v54  ;;  %2288 = vmatpush3.msk.msra.mxu0 %vm1180_vm14, %v1172_v41 }
 0x8e2   :  { %2280 = vmatprep.mubr.msk.f32.mxu1 %vm1072_vm6, %v1070_v59 }
 0x8f1   :  { %v1028_v55 = vpop.trf.xlu0 }
 0x8f2   :  { %vm1044_vm2 = vcmp.gt.f32.partialorder %v1028_v55, 0.0 }
 0x8f3   :  { %v1046_v56 = vsel %vm1044_vm2, 1, %v2574_v44 }
 0x8f4   :  { %1049 = vperm.xlu1 %2483, %v1046_v56  }
 0x8f5   :  { %v1029_v57 = vpop.trf.xlu0 }
 0x8f6   :  { %vm1045_vm3 = vcmp.gt.f32.partialorder %v1029_v57, 0.0 }
 0x8f7   :  { %v1047_v58 = vsel %vm1045_vm3, 1, %v2574_v44  ;;  %v1261_v44 = vld [vmem:[%s3032_s13 + $0x10] sm:$0xff] }
 0x8f8   :  { %1052 = vperm.xlu1 %2483, %v1047_v58   ;;  %v2420_v47 = vpack.c.bf16 %v1262_v46, %v1261_v44 }
 0x8fc   :  { %2484 = vset.pattern.permute.xlu1 %v2567_v17 }
 0x8fd   :  { %1164 = vrot.lane.b32.xlu1 %v2837_v61, %s2575_s30 }
 0x910   :  { %v1163_v52 = vpop.permute.xlu0 %1162 }
 0x973   :  { %v1050_v6 = vpop.permute.xlu1 %1049 }
 0x974   :  { %vm1054_vm10 = vcmp.eq.s32.totalorder %v1050_v6, 1 }
 0x977   :  { %v1053_v8 = vpop.permute.xlu1 %1052 }
 0x978   :  { %vm1055_vm8 = vcmp.eq.s32.totalorder %v1053_v8, 1 }
 0x97b   :  { %v1165_v54 = vpop.permute.xlu1 %1164 }
 0x9b4   :  { %v2277_v10 = vpop.f32.mrb[6].mxu1 }
 0x9b5   :  { %v950_v11 = vadd.f32 %v2277_v10, %v2096_v7  ;;  %v944_v12 = vpop.f32.mrb[7].mxu1 }
 0x9b6   :  { %v945_v13 = vadd.f32 %v2096_v7, %v944_v12 }
 0x9b7   :  { %v999_v14 = vsel %vm997_vm7, %v950_v11, -1e+30  ;;  %v1057_v15 = vsel %vm1055_vm8, %v950_v11, -1e+30  ;;  %vm1718_vm8 = vcmask 547840  }
 0x9b8   :  { %v1001_v16 = vsel %vm312_vm5, %v999_v14, -inf  ;;  %v1059_v21 = vsel %vm312_vm5, %v1057_v15, -inf  ;;  %v998_v23 = vsel %vm996_vm9, %v945_v13, -1e+30  ;;  %v1056_v24 = vsel %vm1054_vm10, %v945_v13, -1e+30 }
 0x9b9   :  { %v1000_v25 = vsel %vm312_vm5, %v998_v23, -inf  ;;  %v1058_v26 = vsel %vm312_vm5, %v1056_v24, -inf  ;;  %vm1811_vm9 = vcmask 1045504  }
 0x9ba   :  { %v1002_v27 = vmax.f32 %v1000_v25, %v1001_v16  ;;  %v1060_v28 = vmax.f32 %v1058_v26, %v1059_v21 }
 0x9bc   :  { %v1003_v29 = vrot.slane %v1002_v27, 4  ;;  %v1061_v30 = vrot.slane %v1060_v28, 4 }
 0x9be   :  { %v1004_v31 = vmax.f32 %v1002_v27, %v1003_v29  ;;  %v1062_v33 = vmax.f32 %v1060_v28, %v1061_v30 }
 0x9c0   :  { %v1005_v34 = vrot.slane %v1004_v31, 2  ;;  %v1063_v35 = vrot.slane %v1062_v33, 2 }
 0x9c2   :  { %v1006_v36 = vmax.f32 %v1004_v31, %v1005_v34  ;;  %v1064_v18 = vmax.f32 %v1062_v33, %v1063_v35 }
 0x9c4   :  { %v1007_v19 = vrot.slane %v1006_v36, 1  ;;  %v1065_v20 = vrot.slane %v1064_v18, 1 }
 0x9c6   :  { %v1008_v37 = vmax.f32 %v1006_v36, %v1007_v19  ;;  %v1066_v38 = vmax.f32 %v1064_v18, %v1065_v20 }
 0x9c8   :  { %v1067_v39 = vsel %vm89_vm0, %v1008_v37, %v1066_v38  ;;  %vm1173_vm0 = vcmask 154624   ;;  %v71_v38 = vld [vmem:[%s3024_s5 + $0x8] sm:$0xff] }
 0x9c9   :  { %2278 = vmatprep.subr.msk.mxu1 %vm1079_vm11, %v1067_v39  ;;  %1069 = vst.msk [vmem:[#allocation2] sm:$0x3] %vm1068_vm13, %v1067_v39 }
 0x9ca   :  { %2279 = vmatpush3.msk.msra.mxu1 %vm1079_vm11, %v1067_v39  ;;  %v70_v39 = vld [vmem:[%s3024_s5] sm:$0xff] }
 0x9cb   :  { %2281 = vmatmul.mubr.msk.f32.vlgmr.msra.gmra.mrb[8].mxu1 %vm1072_vm6, %v1071_v40  ;;  %2417 = vmatprep.subr.bf16.mxu1 %v2416_v45  ;;  %vm73_vm6 = vcmp.gt.f32.partialorder %v71_v38, 0.0  ;;  %vm72_vm7 = vcmp.gt.f32.partialorder %v70_v39, 0.0 }
 0x9cc   :  { %2419 = vmatpush3.bf16.msra.mxu1 %v2416_v45  ;;  %v2921_v40 = vsel %vm73_vm6, 1.0, %v2570_v62  ;;  %v2924_v41 = vsel %vm72_vm7, 1.0, %v2570_v62 }
 0x9cd   :  { %2421 = vmatprep.subr.bf16.mxu1 %v2420_v47 }
 0x9d0   :  { %2423 = vmatpush3.bf16.msra.mxu1 %v2420_v47 }
 0x9d1   :  { %2425 = vmatprep.subr.bf16.mxu1 %v2424_v49 }
 0x9d4   :  { %2427 = vmatpush3.bf16.msra.mxu1 %v2424_v49 }
 0x9d5   :  { %2429 = vmatprep.subr.bf16.mxu1 %v2428_v51 }
 0x9d8   :  { %2431 = vmatpush3.bf16.msra.mxu1 %v2428_v51 }
 0xa9e   :  { %v2282_v53 = vpop.f32.mrb[8].mxu1 }
 0xa9f   :  { %v1149_v55 = vpop.f32.mrb[9].mxu1  ;;  %v1169_v57 = vsel %vm312_vm5, %v2282_v53, %v1165_v54 }
 0xaa0   :  { %v1168_v56 = vsel %vm312_vm5, %v1149_v55, %v1163_v52 }
 0xaa1   :  { %2289 = vmatprep.mubr.msk.f32.mxu0 %vm1173_vm0, %v1168_v56 }
 0xaa2   :  { %2290 = vmatmul.mubr.msk.f32.vlgmr.msra.gmra.mrb[6].mxu0 %vm1173_vm0, %v1169_v57 }
 0xb75   :  { %v2890_v58 = vpop.f32.mrb[6].mxu0 }
 0xb76   :  { %v2892_v59 = vpop.f32.mrb[7].mxu0 }
 0xb77   :  { %v2488_v1 = vpack.i.bf16 %v2890_v58, %v2892_v59  ;;  %v2432_v2 = vpack.c.bf16 %v2890_v58, %v2892_v59  ;;  %2308 = vmatprep.mubr.msk.f32.mxu1 %vm176_vm4, %v2892_v59 }
 0xb78   :  { %2309 = vmatmul.mubr.msk.f32.vlgmr.msra.gmra.mrb[10].mxu1 %vm176_vm4, %v2890_v58 }
 0xb79   :  { %2433 = vmatprep.subr.bf16.mxu0 %v2432_v2 }
 0xb7a   :  { %2435 = vmatpush3.bf16.msra.mxu0 %v2432_v2 }
 0xc4b   :  { %v2310_v3 = vpop.f32.mrb[10].mxu1 }
 0xc4c   :  { %1511 = vrot.lane.b32.xlu1 %v2310_v3, %s2569_s7  ;;  %v1339_v4 = vpop.f32.mrb[11].mxu1 }
 0xc50   :  { %1387 = vperm.xlu1 %2484, %v2310_v3  }
 0xc54   :  { %1509 = vrot.lane.b32.xlu1 %v1339_v4, %s2569_s7 }
 0xc55   :  { %2485 = vset.pattern.permute.xlu1 %v2568_v22 }
 0xc58   :  { %1552 = vperm.xlu1 %2485, %v2310_v3  }
 0xc5c   :  { %2486 = vset.pattern.permute.xlu1 %v2567_v17 }
 0xc5d   :  { %1382 = vperm.xlu1 %2486, %v1339_v4  }
 0xc61   :  { %2487 = vset.pattern.permute.xlu1 %v2568_v22 }
 0xc62   :  { %1548 = vperm.xlu1 %2487, %v1339_v4  }
 0xc8b   :  { %1348 = vxpose.xlu1.b32.start [1/2] (short) (narrow) %v1339_v4, 8 }
 0xc8f   :  { %1349 = vxpose.xlu1.b32.end [2/2] (short) (narrow) %v2310_v3, 8 }
 0xcad   :  { %2493 = vset.pattern.permute.xlu1 %v2573_v9 }
 0xcbe   :  { %v1512_v5 = vpop.permute.xlu1 %1511 }
 0xccf   :  { %v1388_v6 = vpop.permute.xlu1 %1387 }
 0xcd3   :  { %v1510_v7 = vpop.permute.xlu1 %1509 }
 0xcd4   :  { %1515 = vxpose.xlu0.b32.start [1/2] (short) (narrow) %v1510_v7, 8 }
 0xcd7   :  { %v1553_v8 = vpop.permute.xlu1 %1552 }
 0xcd8   :  { %1516 = vxpose.xlu0.b32.end [2/2] (short) (narrow) %v1512_v5, 8 }
 0xcdc   :  { %v1383_v10 = vpop.permute.xlu1 %1382 }
 0xce1   :  { %v1549_v11 = vpop.permute.xlu1 %1548 }
 0xd0b   :  { %v1364_v12 = vpop.trf.xlu1 }
 0xd0c   :  { %v1393_v13 = vrot.slane %v1364_v12, %v2733_v32 }
 0xd0e   :  { %v1394_v17 = vadd.f32 %v1393_v13, %v1383_v10  ;;  %v1395_v14 = vadd.f32 %v1393_v13, %v1388_v6 }
 0xd10   :  { %vm1397_vm15 = vcmp.ge.f32.partialorder %v1395_v14, 0.0  ;;  %v1399_v22 = vmul.f32 0.2, %v1395_v14  ;;  %vm1396_vm1 = vcmp.ge.f32.partialorder %v1394_v17, 0.0  ;;  %v1398_v15 = vmul.f32 0.2, %v1394_v17 }
 0xd12   :  { %v1401_v16 = vsel %vm1397_vm15, %v1395_v14, %v1399_v22  ;;  %v1400_v21 = vsel %vm1396_vm1, %v1394_v17, %v1398_v15 }
 0xd13   :  { %v1405_v9 = vsel %vm312_vm5, %v1401_v16, -inf  ;;  %v1402_v23 = vsel %vm312_vm5, %v1400_v21, -inf }
 0xd14   :  { %1406 = vmax.xlane.f32.xlu0 %v1405_v9  ;;  %1403 = vmax.xlane.f32.xlu1 %v1402_v23  ;;  %v1710_v9 = vld [vmem:[%s3034_s15 + $0x8] sm:$0xff]  ;;  %v1711_v23 = vld [vmem:[%s3034_s15 + $0x10] sm:$0xff] }
 0xd54   :  { %v1531_v24 = vpop.trf.xlu0 }
 0xd55   :  { %v1558_v25 = vrot.slane %v1531_v24, %v2733_v32 }
 0xd57   :  { %v1559_v26 = vadd.f32 %v1558_v25, %v1549_v11  ;;  %v1560_v27 = vadd.f32 %v1558_v25, %v1553_v8  ;;  %v1712_v25 = vld [vmem:[%s3034_s15 + $0x18] sm:$0xff] }
 0xd59   :  { %vm1561_vm2 = vcmp.ge.f32.partialorder %v1559_v26, 0.0  ;;  %v1563_v28 = vmul.f32 0.2, %v1559_v26  ;;  %v1564_v29 = vmul.f32 0.2, %v1560_v27  ;;  %vm1562_vm3 = vcmp.ge.f32.partialorder %v1560_v27, 0.0 }
 0xd5b   :  { %v1565_v30 = vsel %vm1561_vm2, %v1559_v26, %v1563_v28  ;;  %v1566_v33 = vsel %vm1562_vm3, %v1560_v27, %v1564_v29  ;;  %v2444_v26 = vpack.c.bf16 %v1712_v25, %v1711_v23  ;;  %v1713_v27 = vld [vmem:[%s3034_s15 + $0x20] sm:$0xff]  ;;  %v1714_v28 = vld [vmem:[%s3034_s15 + $0x28] sm:$0xff] }
 0xd5c   :  { %v1567_v31 = vsel %vm312_vm5, %v1565_v30, -inf  ;;  %v1570_v34 = vsel %vm312_vm5, %v1566_v33, -inf  ;;  %v2448_v29 = vpack.c.bf16 %v1714_v28, %v1713_v27 }
 0xd5d   :  { %1568 = vmax.xlane.f32.xlu1 %v1567_v31 }
 0xd61   :  { %1571 = vmax.xlane.f32.xlu1 %v1570_v34  ;;  %v1716_v34 = vld [vmem:[%s3034_s15 + $0x38] sm:$0xff] }
 0xda1   :  { %v1407_v35 = vpop.xlane.xlu0 %1406  ;;  %v1404_v36 = vpop.xlane.xlu1 %1403 }
 0xda2   :  { %v1409_v18 = vsub.f32 %v1401_v16, %v1407_v35  ;;  %v1408_v19 = vsub.f32 %v1400_v21, %v1404_v36  ;;  %v1709_v21 = vld [vmem:[%s3034_s15] sm:$0xff] }
 0xda3   :  { %v2440_v24 = vpack.c.bf16 %v1710_v9, %v1709_v21  ;;  %v1717_v36 = vld [vmem:[%s3034_s15 + $0x40] sm:$0x7] }
 0xda4   :  { %v1412_v20 = vmul.f32 1.442695, %v1409_v18  ;;  %v1410_v37 = vmul.f32 1.442695, %v1408_v19 }
 0xda6   :  { %2518 = vpow2.f32 %v1412_v20  ;;  %v2111_v20 = vld [vmem:[%s3033_s14] ss:$0 sm:$0xff] }
 0xda7   :  { %2520 = vpow2.f32 %v1410_v37 }
 0xdb0   :  { %v2519_v42 = vpop.eup %2518 }
 0xdb1   :  { %v2521_v43 = vpop.eup %2520  ;;  %v1415_v44 = vmul.f32 %v2519_v42, %v2921_v40 }
 0xdb2   :  { %v1414_v45 = vmul.f32 %v2521_v43, %v2924_v41 }
 0xdb3   :  { %v1419_v46 = vsel %vm312_vm5, %v1415_v44, 0.0 }
 0xdb4   :  { %1420 = vadd.xlane.f32.xlu0 %v1419_v46  ;;  %v1416_v47 = vsel %vm312_vm5, %v1414_v45, 0.0 }
 0xdb5   :  { %1417 = vadd.xlane.f32.xlu1 %v1416_v47 }
 0xdea   :  { %v1569_v0 = vpop.xlane.xlu1 %1568 }
 0xdeb   :  { %v1573_v48 = vsub.f32 %v1565_v30, %v1569_v0 }
 0xded   :  { %v1575_v49 = vmul.f32 1.442695, %v1573_v48  ;;  %v1803_v48 = vld [vmem:[%s3035_s16] sm:$0x3f]  ;;  %s2577_s16 = smov [#allocation2]  }
 0xdee   :  { %v1572_v50 = vpop.xlane.xlu1 %1571  ;;  %2346 = vmatprep.subr.msk.mxu1 %vm1811_vm9, %v1803_v48 }
 0xdef   :  { %2522 = vpow2.f32 %v1575_v49  ;;  %v1574_v63 = vsub.f32 %v1566_v33, %v1572_v50  ;;  %v1715_v33 = vld [vmem:[%s3034_s15 + $0x30] sm:$0xff]  ;;  %2347 = vmatpush3.msk.msra.mxu1 %vm1811_vm9, %v1803_v48 }
 0xdf0   :  { %v2452_v35 = vpack.c.bf16 %v1716_v34, %v1715_v33 }
 0xdf1   :  { %v1577_v62 = vmul.f32 1.442695, %v1574_v63 }
 0xdf3   :  { %2524 = vpow2.f32 %v1577_v62 }
 0xdf9   :  { %v2523_v51 = vpop.eup %2522 }
 0xdfa   :  { %v1579_v52 = vmul.f32 %v2523_v51, %v2924_v41 }
 0xdfc   :  { %v1581_v53 = vsel %vm312_vm5, %v1579_v52, 0.0 }
 0xdfd   :  { %v2525_v54 = vpop.eup %2524  ;;  %1582 = vadd.xlane.f32.xlu1 %v1581_v53 }
 0xdfe   :  { %v1580_v55 = vmul.f32 %v2525_v54, %v2921_v40 }
 0xe00   :  { %v1584_v56 = vsel %vm312_vm5, %v1580_v55, 0.0 }
 0xe01   :  { %1585 = vadd.xlane.f32.xlu0 %v1584_v56 }
 0xe0e   :  { %2489 = vrot.lane.b32.xlu1 %v2488_v1, %s2571_s28 }
 0xe41   :  { %v1421_v57 = vpop.xlane.xlu0 %1420 }
 0xe42   :  { %v1423_v2 = vmax.f32 %v1421_v57, 1e-20  ;;  %v1418_v3 = vpop.xlane.xlu1 %1417 }
 0xe43   :  { %v1422_v4 = vmax.f32 %v1418_v3, 1e-20 }
 0xe44   :  { %2526 = vrcp.f32 %v1423_v2 }
 0xe45   :  { %2528 = vrcp.f32 %v1422_v4 }
 0xe4e   :  { %v2527_v5 = vpop.eup %2526 }
 0xe4f   :  { %v2529_v6 = vpop.eup %2528  ;;  %v1427_v7 = vmul.f32 %v2527_v5, %v1415_v44 }
 0xe50   :  { %v1426_v8 = vmul.f32 %v2529_v6, %v1414_v45 }
 0xe52   :  { %2315 = vmatprep.mubr.msk.f32.mxu0 %vm312_vm5, %v1426_v8 }
 0xe53   :  { %2316 = vmatmul.mubr.msk.f32.vlgmr.msra.gmra.mrb[8].mxu0 %vm312_vm5, %v1427_v7 }
 0xe8a   :  { %v1583_v10 = vpop.xlane.xlu1 %1582 }
 0xe8b   :  { %v1587_v11 = vmax.f32 %v1583_v10, 1e-20 }
 0xe8d   :  { %2530 = vrcp.f32 %v1587_v11 }
 0xe8e   :  { %v1586_v12 = vpop.xlane.xlu0 %1585  ;;  %v2490_v58 = vpop.permute.xlu1 %2489 }
 0xe8f   :  { %v1588_v59 = vmax.f32 %v1586_v12, 1e-20  ;;  %v2492_v1 = vunpack.i.h.bf16 %v2490_v58  ;;  %v2491_v13 = vunpack.i.l.bf16 %v2490_v58 }
 0xe91   :  { %2532 = vrcp.f32 %v1588_v59  ;;  %v2436_v17 = vpack.c.bf16 %v2492_v1, %v2491_v13 }
 0xe93   :  { %2437 = vmatprep.subr.bf16.mxu0 %v2436_v17 }
 0xe94   :  { %2439 = vmatpush3.bf16.msra.mxu0 %v2436_v17 }
 0xe95   :  { %2441 = vmatprep.subr.bf16.mxu0 %v2440_v24 }
 0xe97   :  { %v2531_v14 = vpop.eup %2530 }
 0xe98   :  { %v1591_v22 = vmul.f32 %v2531_v14, %v1579_v52 }
 0xe9a   :  { %2322 = vmatprep.mubr.msk.f32.mxu0 %vm312_vm5, %v1591_v22 }
 0xe9b   :  { %v2533_v15 = vpop.eup %2532 }
 0xe9c   :  { %v1592_v16 = vmul.f32 %v2533_v15, %v1580_v55 }
 0xe9e   :  { %2323 = vmatmul.mubr.msk.f32.vlgmr.msra.gmra.mrb[10].mxu0 %vm312_vm5, %v1592_v16 }
 0xe9f   :  { %2443 = vmatpush3.bf16.msra.mxu0 %v2440_v24 }
 0xea0   :  { %2445 = vmatprep.subr.bf16.mxu0 %v2444_v26 }
 0xea3   :  { %2447 = vmatpush3.bf16.msra.mxu0 %v2444_v26 }
 0xea4   :  { %2449 = vmatprep.subr.bf16.mxu0 %v2448_v29 }
 0xea7   :  { %2451 = vmatpush3.bf16.msra.mxu0 %v2448_v29 }
 0xea8   :  { %2453 = vmatprep.subr.bf16.mxu0 %v2452_v35 }
 0xeab   :  { %2455 = vmatpush3.bf16.msra.mxu0 %v2452_v35 }
 0xeac   :  { %2341 = vmatprep.subr.msk.mxu0 %vm1180_vm14, %v1717_v36 }
 0xeaf   :  { %2342 = vmatpush3.msk.msra.mxu0 %vm1180_vm14, %v1717_v36 }
 0xf26   :  { %v2317_v30 = vpop.f32.mrb[8].mxu0 }
 0xf27   :  { %v1500_v31 = vpop.f32.mrb[9].mxu0 }
 0xf71   :  { %v2324_v18 = vpop.f32.mrb[10].mxu0 }
 0xf72   :  { %1684 = vrot.lane.b32.xlu1 %v2324_v18, %s2572_s1  ;;  %v1671_v19 = vpop.f32.mrb[11].mxu0 }
 0xf73   :  { %1682 = vrot.lane.b32.xlu0 %v1671_v19, %s2572_s1  ;;  %s2066_s1 = sshll.u32 %s2577_s16, 4  ;;  %s2067_s1 = int_to_ptr.vmem [resolvable:$true] %s2066_s1 }
 0xf74   :  { %s2542_s7 = scalar_lea.vmem %s2067_s1, 32  ;;  %p2547_p1 = scmp.lt.s32.totalorder %s2067_s1, %s2067_s1 }
 0xf75   :  { %p2543_p0 = scmp.ne.s32.totalorder %s2067_s1, %s2542_s7  ;;  %p2548_p2 = scmp.lt.s32.totalorder %s2542_s7, %s2542_s7 }
 0xf76   :  { %1701 = vrot.lane.b32.xlu1 %v2832_v60, %s2576_s4 }
 0xf77   :  { %1703 = vrot.lane.b32.xlu0 %v2837_v61, %s2576_s4  ;;  %p2549_p3 = por %p2548_p2, %p2547_p1 }
 0xf79   :  { %p2550_p4 = pnand %p2549_p3, %p2543_p0 }
 0xfe4   :  { %v1685_v37 = vpop.permute.xlu1 %1684 }
 0xfe5   :  { %v1689_v38 = vsel %vm599_vm12, %v2317_v30, %v1685_v37  ;;  %v1683_v39 = vpop.permute.xlu0 %1682 }
 0xfe6   :  { %v1698_v42 = vadd.f32 %v2111_v20, %v1689_v38  ;;  %v1688_v43 = vsel %vm599_vm12, %v1500_v31, %v1683_v39  ;;  %vm1804_vm12 = vcmask 48128  }
 0xfe7   :  { %v1697_v44 = vadd.f32 %v2111_v20, %v1688_v43 }
 0xfe8   :  { %v1700_v45 = vmax.f32 %v1698_v42, 0.0  ;;  %v1702_v46 = vpop.permute.xlu1 %1701 }
 0xfe9   :  { %v1699_v47 = vmax.f32 %v1697_v44, 0.0  ;;  %v1704_v0 = vpop.permute.xlu0 %1703 }
 0xfea   :  { %v1708_v61 = vsel %vm176_vm4, %v1700_v45, %v1704_v0 }
 0xfeb   :  { %v1707_v60 = vsel %vm176_vm4, %v1699_v47, %v1702_v46 }
 0xfec   :  { %2343 = vmatprep.mubr.msk.f32.mxu0 %vm1718_vm8, %v1707_v60 }
 0xfed   :  { %2344 = vmatmul.mubr.msk.f32.vlgmr.msra.gmra.mrb[12].mxu0 %vm1718_vm8, %v1708_v61 }
0x10c0   :  { %v2345_v49 = vpop.f32.mrb[12].mxu0 }
0x10c1   :  { %v1794_v50 = vpop.f32.mrb[13].mxu0 }
0x10c2   :  { %v2456_v63 = vpack.c.bf16 %v2345_v49, %v1794_v50  ;;  %2348 = vmatprep.mubr.msk.f32.mxu1 %vm1804_vm12, %v1794_v50 }
0x10c3   :  { %2349 = vmatmul.mubr.msk.f32.vlgmr.msra.gmra.mrb[12].mxu1 %vm1804_vm12, %v2345_v49 }
0x10c4   :  { %2457 = vmatprep.subr.bf16.mxu1 %v2456_v63 }
0x10c5   :  { %2459 = vmatpush3.bf16.msra.mxu1 %v2456_v63 }
0x1196   :  { %v2350_v62 = vpop.f32.mrb[12].mxu1 }
0x1197   :  { %1929 = vperm.xlu0 %2481, %v2350_v62   ;;  %v1881_v51 = vpop.f32.mrb[13].mxu1 }
0x1198   :  { %1924 = vperm.xlu1 %2493, %v1881_v51  }
0x11c1   :  { %1890 = vxpose.xlu1.b32.start [1/2] (short) (narrow) %v1881_v51, 8 }
0x11c5   :  { %1891 = vxpose.xlu1.b32.end [2/2] (short) (narrow) %v2350_v62, 8 }
0x1216   :  { %v1930_v55 = vpop.permute.xlu0 %1929 }
0x1217   :  { %v1925_v52 = vpop.permute.xlu1 %1924 }
0x1241   :  { %v1906_v53 = vpop.trf.xlu1 }
0x1242   :  { %v1935_v54 = vrot.slane %v1906_v53, %v2733_v32 }
0x1244   :  { %v1936_v56 = vadd.f32 %v1935_v54, %v1925_v52  ;;  %v1937_v57 = vadd.f32 %v1935_v54, %v1930_v55 }
0x1246   :  { %vm1938_vm4 = vcmp.ge.f32.partialorder %v1936_v56, 0.0  ;;  %v1940_v2 = vmul.f32 0.2, %v1936_v56  ;;  %v1941_v3 = vmul.f32 0.2, %v1937_v57  ;;  %vm1939_vm10 = vcmp.ge.f32.partialorder %v1937_v57, 0.0 }
0x1248   :  { %v1942_v4 = vsel %vm1938_vm4, %v1936_v56, %v1940_v2  ;;  %v1943_v6 = vsel %vm1939_vm10, %v1937_v57, %v1941_v3 }
0x1249   :  { %v1944_v5 = vsel %vm312_vm5, %v1942_v4, -inf  ;;  %v1947_v7 = vsel %vm312_vm5, %v1943_v6, -inf }
0x124a   :  { %1945 = vmax.xlane.f32.xlu0 %v1944_v5 }
0x124e   :  { %1948 = vmax.xlane.f32.xlu0 %v1947_v7 }
0x12d7   :  { %v1946_v8 = vpop.xlane.xlu0 %1945 }
0x12d8   :  { %v1950_v10 = vsub.f32 %v1942_v4, %v1946_v8 }
0x12da   :  { %v1952_v11 = vmul.f32 1.442695, %v1950_v10 }
0x12db   :  { %v1949_v12 = vpop.xlane.xlu0 %1948 }
0x12dc   :  { %2534 = vpow2.f32 %v1952_v11  ;;  %v1951_v32 = vsub.f32 %v1943_v6, %v1949_v12 }
0x12de   :  { %v1954_v58 = vmul.f32 1.442695, %v1951_v32 }
0x12e0   :  { %2536 = vpow2.f32 %v1954_v58 }
0x12e6   :  { %v2535_v59 = vpop.eup %2534 }
0x12e7   :  { %v1956_v1 = vmul.f32 %v2535_v59, %v2924_v41 }
0x12e9   :  { %v1958_v13 = vsel %vm312_vm5, %v1956_v1, 0.0 }
0x12ea   :  { %v2537_v17 = vpop.eup %2536  ;;  %1959 = vadd.xlane.f32.xlu0 %v1958_v13 }
0x12eb   :  { %v1957_v14 = vmul.f32 %v2537_v17, %v2921_v40 }
0x12ed   :  { %v1961_v22 = vsel %vm312_vm5, %v1957_v14, 0.0 }
0x12ee   :  { %1962 = vadd.xlane.f32.xlu0 %v1961_v22 }
0x1377   :  { %v1960_v15 = vpop.xlane.xlu0 %1959 }
0x1378   :  { %v1964_v16 = vmax.f32 %v1960_v15, 1e-20 }
0x137a   :  { %2538 = vrcp.f32 %v1964_v16 }
0x137b   :  { %v1963_v21 = vpop.xlane.xlu0 %1962 }
0x137c   :  { %v1965_v9 = vmax.f32 %v1963_v21, 1e-20 }
0x137e   :  { %2540 = vrcp.f32 %v1965_v9 }
0x1384   :  { %v2539_v23 = vpop.eup %2538 }
0x1385   :  { %v1968_v24 = vmul.f32 %v2539_v23, %v1956_v1 }
0x1387   :  { %2355 = vmatprep.mubr.msk.f32.mxu1 %vm312_vm5, %v1968_v24 }
0x1388   :  { %v2541_v41 = vpop.eup %2540 }
0x1389   :  { %v1969_v25 = vmul.f32 %v2541_v41, %v1957_v14 }
0x138b   :  { %2356 = vmatmul.mubr.msk.f32.vlgmr.msra.gmra.mrb[14].mxu1 %vm312_vm5, %v1969_v25 }
0x138c   :  { %2553 = shalt.err (!%p2550_p4)
}
0x138d   :  { %s2554_s5 = scalar_lea.hbm %s3037_s18, 32 }
0x138e   :  { %p2555_p5 = scmp.ne.s32.totalorder %s3037_s18, %s2554_s5  ;;  %p2558_p6 = scmp.lt.u32.totalorder %s2554_s5, %s3037_s18 }
0x1390   :  { %p2560_p7 = pnand %p2558_p6, %p2555_p5 }
0x1392   :  { %2563 = shalt.err (!%p2560_p7)
}
0x1393   :  { %2069 = dma.vmem_to_hbm [thread:$0]  %s2067_s1, 32, %s3037_s18, [#allocation3]   ;;  %v2118_v40 = vld [vmem:[%s3036_s17] ss:$0 sm:$0xff] }
0x145e   :  { %v2357_v26 = vpop.f32.mrb[14].mxu1 }
0x145f   :  { %v2055_v27 = vadd.f32 %v2357_v26, %v2118_v40  ;;  %v2049_v28 = vpop.f32.mrb[15].mxu1 }
0x1460   :  { %v2050_v29 = vadd.f32 %v2118_v40, %v2049_v28 }
0x1461   :  { %2059 = vst.msk [vmem:[%s3038_s19 + $0x8] sm:$0xff] %vm1804_vm12, %v2055_v27 }
0x1462   :  { %2058 = vst.msk [vmem:[%s3038_s19] sm:$0xff] %vm1804_vm12, %v2050_v29 }
0x1463   :  { %2564 = dma.done.wait [#allocation3], 32  }
0x1464   :  { %2565 = vsyncadd [#allocation3], 4294967264 }
0x1465   :  { %2077 = vsyncpa [#allocation3], 1 }

</bundles_post_ra>
